<compile_context>
chip_gen: v6e
topology: v6e:2x2x1
jax: 0.10.0
libtpu: 0.0.40
codegen_flags: <defaults>
</compile_context>

<pallas_src>
import functools
import math

import jax
import jax.numpy as jnp
from jax.experimental import pallas as pl
from jax.experimental.pallas import tpu as pltpu

F32 = jnp.float32
BF16 = jnp.bfloat16


def _layernorm(x, g, b, eps=1e-5):
    mu = jnp.mean(x, axis=-1, keepdims=True)
    var = jnp.mean((x - mu) ** 2, axis=-1, keepdims=True)
    return (x - mu) * jax.lax.rsqrt(var + eps) * g + b


def _attention(q2d, k2d, v2d, B, N, H, hd):
    """Eval-mode MHA core on bf16 (B*N, E) operands.

    Head/batch-major data exists only between the score and PV contractions;
    it is built with static slices + stack (no in-kernel reshape/broadcast).
    The softmax scale is pre-folded into the Q projection.
    """
    def to_groups(x):  # (B*N, H*hd) -> (B*H, N, hd)
        return jnp.stack([x[b * N:(b + 1) * N, h * hd:(h + 1) * hd]
                          for b in range(B) for h in range(H)], axis=0)

    q = to_groups(q2d)
    k = to_groups(k2d)
    v = to_groups(v2d)
    s = jnp.einsum('gqd,gkd->gqk', q, k, preferred_element_type=F32)      # (B*H,N,N)
    s = s - jnp.max(s, axis=-1, keepdims=True)
    p = jnp.exp(s)
    p = p * pl.reciprocal(jnp.sum(p, axis=-1, keepdims=True), approx=True)
    o = jnp.einsum('gqk,gkd->gqd', p.astype(BF16), v,
                   preferred_element_type=F32)                            # (B*H,N,hd)
    # (B*H, N, hd) -> (B*N, H*hd): heads concat along lanes, batches along rows.
    rows = [jnp.concatenate([o[b * H + h] for h in range(H)], axis=-1)
            for b in range(B)]
    return jnp.concatenate(rows, axis=0)                                  # (B*N,E) f32


def sgcm_kernel(dims, off32, offv,
                acts_ref, w32_ref, wkv_ref, wgcn_ref, wadj_ref, wpt_ref,
                vecs_ref, out_ref):
    B, N, E, I, H = dims
    T = B * N
    hd = E // H

    def w32(name):
        a, b = off32[name]
        return w32_ref[a:b, :]

    def vec(name, ncols):
        a, b = offv[name]
        return vecs_ref[a:b, 0:ncols]

    # ---- inputs: image tokens stacked over batch, then text tokens ----
    img_bf = acts_ref[0:T, :].astype(BF16)
    text_bf = acts_ref[T:2 * T, :].astype(BF16)

    # ---- Embeddings: Conv2d(k=1) == per-token linear; (bias + pos) pre-summed ----
    img_feat = (jnp.dot(img_bf, w32('pe_w'), preferred_element_type=F32)
                + vec('pos_eff', E))                                      # (T, E)
    img_feat_bf = img_feat.astype(BF16)
    # Dropout(0.1): eval -> identity

    # ---- linear_proj(cat([img_feat, text], -1)) as split-weight sum ----
    x = (jnp.dot(img_feat_bf, w32('lp_wi'), preferred_element_type=F32)
         + jnp.dot(text_bf, w32('lp_wt'), preferred_element_type=F32)
         + vec('lp_b', E))                                                # (T, E)
    x_bf = x.astype(BF16)

    # ---- SpectralGCN ----
    x_phi = _layernorm(
        jnp.dot(x_bf, wpt_ref[0:E, :], preferred_element_type=F32),
        vec('phi_g', I), vec('phi_b', I))                                 # (T, I)
    x_theta = _layernorm(
        jnp.dot(x_bf, wpt_ref[E:2 * E, :], preferred_element_type=F32),
        vec('th_g', I), vec('th_b', I))                                   # (T, I)

    adj_w = wadj_ref[...]                                                 # (N, N) bf16
    adj_s = vec('adj_s', N)
    adj_sh = vec('adj_sh', N)
    wg_wz = wgcn_ref[0:N, :]                                              # (N, 2N) bf16
    wg_wzi = wgcn_ref[N:2 * N, :]
    wg_s = vec('wg_s', 2 * N)
    wg_sh = vec('wg_sh', 2 * N)

    fz_rows = []
    for b in range(B):                                                    # B=2, unrolled
        xp = x_phi[b * N:(b + 1) * N, :].astype(BF16)                     # (N, I)
        xt = x_theta[b * N:(b + 1) * N, :].astype(BF16)
        # z_idt = x_phi @ x_theta^T: contract the minor axis of BOTH operands.
        zi = jax.lax.dot_general(xp, xt, (((1,), (1,)), ((), ())),
                                 preferred_element_type=F32)              # (N, N)
        zi_bf = zi.astype(BF16)
        # conv_adj (Conv1d(N,N,1), weight pre-transposed) + folded BatchNorm1d.
        # BN channel == Conv1d output channel == column axis of z here.
        z = jnp.dot(zi_bf, adj_w, preferred_element_type=F32) * adj_s + adj_sh
        z = z + zi                                                        # (N, N)
        # conv_wg on cat([z, z_idt], -1) as split-weight sum + folded BN.
        fz = (jnp.dot(z.astype(BF16), wg_wz, preferred_element_type=F32)
              + jnp.dot(zi_bf, wg_wzi, preferred_element_type=F32))       # (N, 2N)
        fz_rows.append(fz * wg_s + wg_sh)
    fz_all = jnp.concatenate(fz_rows, axis=0)                             # (T, 2N)

    gout = jnp.dot(fz_all.astype(BF16), w32('gproj_w'),
                   preferred_element_type=F32)                            # (T, E)
    key_nodes = jnp.maximum(x + gout, 0.0)                                # relu(x + out)
    key_bf = key_nodes.astype(BF16)

    # ---- fused lane-dense K/V projections for both attentions ----
    # (key bias cancels in softmax; value bias is folded into the output bias)
    kvh = jnp.dot(key_bf, wkv_ref[...], preferred_element_type=F32)       # (T, 4E)
    k_img = kvh[:, 0:E].astype(BF16)
    v_img = kvh[:, E:2 * E].astype(BF16)
    k_txt = kvh[:, 2 * E:3 * E].astype(BF16)
    v_txt = kvh[:, 3 * E:4 * E].astype(BF16)

    # ---- cross attentions (query = img/text tokens, K/V = graph nodes) ----
    q_img = (jnp.dot(img_feat_bf, w32('ai_qw'), preferred_element_type=F32)
             + vec('ai_qb', E)).astype(BF16)                              # scale folded
    q_txt = (jnp.dot(text_bf, w32('at_qw'), preferred_element_type=F32)
             + vec('at_qb', E)).astype(BF16)

    o_img = _attention(q_img, k_img, v_img, B, N, H, hd)                  # (T, E) f32
    o_txt = _attention(q_txt, k_txt, v_txt, B, N, H, hd)

    img_attn = (jnp.dot(o_img.astype(BF16), w32('ai_ow'),
                        preferred_element_type=F32) + vec('ai_ob', E))
    txt_attn = (jnp.dot(o_txt.astype(BF16), w32('at_ow'),
                        preferred_element_type=F32) + vec('at_ob', E))

    out_ref[0] = txt_attn
    out_ref[1] = img_attn


def _pack_params(p, E, N, B, H):
    """Trace-time (free) repacking of module-style params into 6 packed blocks."""
    I = p["phi_w"].shape[1]
    hd = E // H
    scale = 1.0 / math.sqrt(hd)
    W = max(E, 2 * N)                      # lane width of the f32 bias/scale block

    def attn_2d(qkv_w, qkv_b, o_w, o_b):
        qw = qkv_w[:, :E] * scale          # (E, E): softmax scale folded into Q
        qb = qkv_b[:, :E] * scale          # (1, E)
        kw = qkv_w[:, E:2 * E]             # (E, E): key bias cancels in softmax
        vw = qkv_w[:, 2 * E:]              # (E, E)
        vb = qkv_b[:, 2 * E:]              # (1, E)
        ob = o_b + jnp.dot(vb, o_w)        # value bias folded through the out proj
        return qw, qb, kw, vw, o_w, ob

    ai_qw, ai_qb, ai_kw, ai_vw, ai_ow, ai_ob = attn_2d(
        p["ai_qkv_w"], p["ai_qkv_b"], p["ai_o_w"], p["ai_o_b"])
    at_qw, at_qb, at_kw, at_vw, at_ow, at_ob = attn_2d(
        p["at_qkv_w"], p["at_qkv_b"], p["at_o_w"], p["at_o_b"])

    # block 1: all E-column matmul weights, sublane-stacked, bf16
    blocks = [("pe_w", p["pe_w"]),
              ("lp_wi", p["lp_w"][:E, :]), ("lp_wt", p["lp_w"][E:, :]),
              ("gproj_w", p["gproj_w"]),
              ("ai_qw", ai_qw), ("at_qw", at_qw),
              ("ai_ow", ai_ow), ("at_ow", at_ow)]
    off32, mats, r = {}, [], 0
    for name, w in blocks:
        off32[name] = (r, r + w.shape[0])
        r += w.shape[0]
        mats.append(w)
    w32 = jnp.concatenate(mats, axis=0).astype(BF16)

    # block 2: fused K/V projection for both attentions, (E, 4E) bf16
    wkv = jnp.concatenate([ai_kw, ai_vw, at_kw, at_vw], axis=1).astype(BF16)

    # block 3: conv_wg weight, pre-transposed (2N, 2N) bf16 (rows split in-kernel)
    wgcn = p["wg_w"].T.astype(BF16)

    # block 4: conv_adj weight, pre-transposed (N, N) bf16
    wadj = p["adj_w"].T.astype(BF16)

    # block 5: phi / theta weights stacked, (2E, I) bf16
    wpt = jnp.concatenate([p["phi_w"], p["th_w"]], axis=0).astype(BF16)

    # block 6: all f32 bias / scale / shift rows, lane-padded to W columns
    def row(v):
        v = jnp.asarray(v, F32).reshape(1, -1)
        return jnp.pad(v, ((0, 0), (0, W - v.shape[1])))

    pos_eff = jnp.pad(jnp.tile(p["pos"], (B, 1)) + p["pe_b"],
                      ((0, 0), (0, W - E)))                               # (B*N, W)
    vec_rows = [("pos_eff", pos_eff),
                ("lp_b", row(p["lp_b"])),
                ("ai_qb", row(ai_qb)), ("at_qb", row(at_qb)),
                ("ai_ob", row(ai_ob)), ("at_ob", row(at_ob)),
                ("wg_s", row(p["wg_s"])), ("wg_sh", row(p["wg_sh"])),
                ("adj_s", row(p["adj_s"])), ("adj_sh", row(p["adj_sh"])),
                ("phi_g", row(p["phi_g"])), ("phi_b", row(p["phi_b"])),
                ("th_g", row(p["th_g"])), ("th_b", row(p["th_b"]))]
    offv, rows, r = {}, [], 0
    for name, v in vec_rows:
        offv[name] = (r, r + v.shape[0])
        r += v.shape[0]
        rows.append(v)
    vecs = jnp.concatenate(rows, axis=0)
    pad = (-vecs.shape[0]) % 8
    if pad:
        vecs = jnp.pad(vecs, ((0, pad), (0, 0)))

    return (w32, wkv, wgcn, wadj, wpt, vecs), off32, offv


def _zero2(i):
    return (0, 0)


def _zero3(i):
    return (0, 0, 0)


def sgcm_forward(img, text_feat, params, nheads):
    B, C, Himg, Wimg = img.shape
    N = Himg * Wimg
    E = C
    I = params["phi_w"].shape[1]
    T = B * N

    # glue: NCHW -> (B*N, E) tokens (Conv2d(k=1) + flatten(2) + transpose),
    # stacked over batch; text tokens stacked below the image tokens.
    img_tok = jnp.transpose(img.reshape(B, C, N), (0, 2, 1)).reshape(T, E)
    acts = jnp.concatenate([img_tok, text_feat.reshape(T, E)],
                           axis=0).astype(F32)                            # (2T, E)

    weights, off32, offv = _pack_params(params, E, N, B, nheads)

    in_specs = ([pl.BlockSpec(acts.shape, _zero2)]
                + [pl.BlockSpec(w.shape, _zero2) for w in weights])
    out_spec = pl.BlockSpec((2, T, E), _zero3)

    grid_spec = pltpu.PrefetchScalarGridSpec(
        num_scalar_prefetch=0,
        grid=(1,),                         # batch folded into the token axis
        in_specs=in_specs,
        out_specs=out_spec,
    )

    # advisory cost estimate so XLA schedules this small custom call sensibly
    flops = (
        2 * T * E * E                      # patch embedding
        + 2 * T * (2 * E) * E              # linear_proj
        + 2 * (2 * T * E * I)              # phi + theta
        + B * 2 * N * I * N                # z_idt
        + B * 2 * N * N * N                # conv_adj
        + B * 2 * N * (2 * N) * (2 * N)    # conv_wg
        + 2 * T * (2 * N) * E              # gcn proj
        + 2 * T * E * (4 * E)              # fused K/V projections
        + 2 * (2 * T * E * E)              # two Q projections
        + 2 * (2 * 2 * T * N * E)          # scores + PV for both attentions
        + 2 * (2 * T * E * E)              # two output projections
    )
    transcendentals = 2 * B * nheads * N * N
    bytes_accessed = (sum(int(w.size) * w.dtype.itemsize for w in weights)
                      + int(acts.size) * 4 + 2 * T * E * 4)

    kernel = functools.partial(sgcm_kernel, (B, N, E, I, nheads), off32, offv)

    out = pl.pallas_call(
        kernel,
        out_shape=jax.ShapeDtypeStruct((2, T, E), jnp.float32),
        grid_spec=grid_spec,
        compiler_params=pltpu.CompilerParams(
            dimension_semantics=("arbitrary",)),
        cost_estimate=pl.CostEstimate(flops=int(flops),
                                      transcendentals=int(transcendentals),
                                      bytes_accessed=int(bytes_accessed)),
    )(acts, *weights)

    text_out = out[0].reshape(B, N, E)
    # glue: einops.rearrange 'B (H W) C -> B C H W'
    img_out = jnp.transpose(out[1].reshape(B, N, E),
                            (0, 2, 1)).reshape(B, E, Himg, Wimg)
    return text_out, img_out


def init_params(key, E, N):
    """Deterministic parameter init; shapes mirror the PyTorch module (eval)."""
    I = E // 4                             # SpectralGCN inter_dim (ratio=4)
    ks = jax.random.split(key, 32)

    def rnd(k, shape, scale=0.1):
        return scale * jax.random.normal(k, shape, dtype=F32)

    eps = 1e-5
    p = {}
    # Embeddings: Conv2d(C, C, k=1) weight stored pre-transposed (in, out)
    p["pe_w"] = rnd(ks[0], (E, E))
    p["pe_b"] = rnd(ks[1], (1, E))
    p["pos"] = jnp.zeros((N, E), F32)      # nn.Parameter(torch.zeros(1, N, C))
    # linear_proj: Linear(2E, E), weight stored pre-transposed (2E, E)
    p["lp_w"] = rnd(ks[2], (2 * E, E))
    p["lp_b"] = rnd(ks[3], (1, E))
    # SpectralGCN
    p["phi_w"] = rnd(ks[4], (E, I))
    p["phi_g"] = jnp.ones((1, I), F32)
    p["phi_b"] = jnp.zeros((1, I), F32)
    p["th_w"] = rnd(ks[5], (E, I))
    p["th_g"] = jnp.ones((1, I), F32)
    p["th_b"] = jnp.zeros((1, I), F32)
    p["adj_w"] = rnd(ks[6], (N, N))        # Conv1d(N, N, k=1) weight squeezed
    adj_gamma = 1.0 + rnd(ks[7], (N, 1), 0.05)
    adj_beta = rnd(ks[8], (N, 1), 0.05)
    adj_mean = rnd(ks[9], (N, 1), 0.05)
    adj_var = 1.0 + jnp.abs(rnd(ks[10], (N, 1), 0.05))
    p["adj_s"] = adj_gamma * jax.lax.rsqrt(adj_var + eps)    # folded BN scale
    p["adj_sh"] = adj_beta - adj_mean * p["adj_s"]           # folded BN shift
    p["wg_w"] = rnd(ks[11], (2 * N, 2 * N))                  # Conv1d(2N,2N,k=1) squeezed
    wg_gamma = 1.0 + rnd(ks[12], (2 * N, 1), 0.05)
    wg_beta = rnd(ks[13], (2 * N, 1), 0.05)
    wg_mean = rnd(ks[14], (2 * N, 1), 0.05)
    wg_var = 1.0 + jnp.abs(rnd(ks[15], (2 * N, 1), 0.05))
    p["wg_s"] = wg_gamma * jax.lax.rsqrt(wg_var + eps)
    p["wg_sh"] = wg_beta - wg_mean * p["wg_s"]
    p["gproj_w"] = rnd(ks[16], (2 * N, E))                   # Linear(2N,E,bias=False), pre-T
    # MultiheadAttention (img): in_proj stored transposed (E,3E); out_proj transposed (E,E)
    p["ai_qkv_w"] = rnd(ks[17], (E, 3 * E))
    p["ai_qkv_b"] = rnd(ks[18], (1, 3 * E))
    p["ai_o_w"] = rnd(ks[19], (E, E))
    p["ai_o_b"] = rnd(ks[20], (1, E))
    # MultiheadAttention (text)
    p["at_qkv_w"] = rnd(ks[21], (E, 3 * E))
    p["at_qkv_b"] = rnd(ks[22], (1, 3 * E))
    p["at_o_w"] = rnd(ks[23], (E, E))
    p["at_o_b"] = rnd(ks[24], (1, E))
    return p


if __name__ == "__main__":
    # Module config consistent with SGCM: img_size=4, patch_size=1 (required so
    # n_patches == img_size**2 == H*W for the GCN and the final rearrange),
    # channel_num == embed_dim == 32, num_heads=8 -> each attention uses 4 heads.
    B, C, H, W = 2, 32, 4, 4
    E, N = C, H * W
    num_heads = 8
    nheads = num_heads // 2

    key = jax.random.PRNGKey(0)
    k_img, k_txt, k_par = jax.random.split(key, 3)
    img = jax.random.normal(k_img, (B, C, H, W), dtype=jnp.float32)
    text_feat = jax.random.normal(k_txt, (B, N, E), dtype=jnp.float32)
    params = init_params(k_par, E, N)

    fwd = jax.jit(functools.partial(sgcm_forward, nheads=nheads))
    text_out, img_out = fwd(img, text_feat, params)
    jax.block_until_ready((text_out, img_out))
    assert text_out.shape == (B, N, E), text_out.shape
    assert img_out.shape == (B, E, H, W), img_out.shape
    # TODO(synk): train-mode Dropout / batch-statistic BatchNorm are not implemented
    # (eval-mode semantics used: dropout identity, BN folded to scale/shift).
    print("KERNEL_OK")
</pallas_src>

<mosaic_0001>
module attributes {stable_mosaic.version = 11 : i64} {
  func.func @sgcm_kernel(%arg0: i32, %arg1: memref<64x32xf32, #tpu.memory_space<vmem>>, %arg2: memref<256x32xbf16, #tpu.memory_space<vmem>>, %arg3: memref<32x128xbf16, #tpu.memory_space<vmem>>, %arg4: memref<32x32xbf16, #tpu.memory_space<vmem>>, %arg5: memref<16x16xbf16, #tpu.memory_space<vmem>>, %arg6: memref<64x8xbf16, #tpu.memory_space<vmem>>, %arg7: memref<48x32xf32, #tpu.memory_space<vmem>>, %arg8: memref<2x32x32xf32, #tpu.memory_space<vmem>>) attributes {dimension_semantics = [#tpu.dimension_semantics<arbitrary>], iteration_bounds = array<i64: 1>, scalar_prefetch = 0 : i64, scratch_operands = 0 : i64, tpu.core_type = #tpu.core_type<tc>, window_params = [{pipeline_mode = #tpu.pipeline_mode<synchronous>, transform_indices = @transform_0, window_bounds = array<i64: 64, 32>}, {pipeline_mode = #tpu.pipeline_mode<synchronous>, transform_indices = @transform_1, window_bounds = array<i64: 256, 32>}, {pipeline_mode = #tpu.pipeline_mode<synchronous>, transform_indices = @transform_2, window_bounds = array<i64: 32, 128>}, {pipeline_mode = #tpu.pipeline_mode<synchronous>, transform_indices = @transform_3, window_bounds = array<i64: 32, 32>}, {pipeline_mode = #tpu.pipeline_mode<synchronous>, transform_indices = @transform_4, window_bounds = array<i64: 16, 16>}, {pipeline_mode = #tpu.pipeline_mode<synchronous>, transform_indices = @transform_5, window_bounds = array<i64: 64, 8>}, {pipeline_mode = #tpu.pipeline_mode<synchronous>, transform_indices = @transform_6, window_bounds = array<i64: 48, 32>}, {pipeline_mode = #tpu.pipeline_mode<synchronous>, transform_indices = @transform_7, window_bounds = array<i64: 2, 32, 32>}]} {
    %c0 = arith.constant 0 : index
    %c0_0 = arith.constant 0 : index
    %0 = vector.load %arg1[%c0, %c0_0] : memref<64x32xf32, #tpu.memory_space<vmem>>, vector<32x32xf32>
    %1 = arith.truncf %0 : vector<32x32xf32> to vector<32x32xbf16>
    %c32 = arith.constant 32 : index
    %c0_1 = arith.constant 0 : index
    %2 = vector.load %arg1[%c32, %c0_1] : memref<64x32xf32, #tpu.memory_space<vmem>>, vector<32x32xf32>
    %3 = arith.truncf %2 : vector<32x32xf32> to vector<32x32xbf16>
    %c0_2 = arith.constant 0 : index
    %c0_3 = arith.constant 0 : index
    %4 = vector.load %arg2[%c0_2, %c0_3] : memref<256x32xbf16, #tpu.memory_space<vmem>>, vector<32x32xbf16>
    %cst = arith.constant dense<0.000000e+00> : vector<32x32xf32>
    %5 = tpu.matmul %1, %4, %cst {dimension_numbers = #tpu.dot_dimension_numbers<[1], [0], [0], [1], [0, 0, 1, 1], [], []>} : vector<32x32xbf16>, vector<32x32xbf16>, vector<32x32xf32> -> vector<32x32xf32>
    %c0_4 = arith.constant 0 : index
    %c0_5 = arith.constant 0 : index
    %6 = vector.load %arg7[%c0_4, %c0_5] : memref<48x32xf32, #tpu.memory_space<vmem>>, vector<32x32xf32>
    %7 = arith.addf %5, %6 : vector<32x32xf32>
    %8 = arith.truncf %7 : vector<32x32xf32> to vector<32x32xbf16>
    %c32_6 = arith.constant 32 : index
    %c0_7 = arith.constant 0 : index
    %9 = vector.load %arg2[%c32_6, %c0_7] : memref<256x32xbf16, #tpu.memory_space<vmem>>, vector<32x32xbf16>
    %cst_8 = arith.constant dense<0.000000e+00> : vector<32x32xf32>
    %10 = tpu.matmul %8, %9, %cst_8 {dimension_numbers = #tpu.dot_dimension_numbers<[1], [0], [0], [1], [0, 0, 1, 1], [], []>} : vector<32x32xbf16>, vector<32x32xbf16>, vector<32x32xf32> -> vector<32x32xf32>
    %c64 = arith.constant 64 : index
    %c0_9 = arith.constant 0 : index
    %11 = vector.load %arg2[%c64, %c0_9] : memref<256x32xbf16, #tpu.memory_space<vmem>>, vector<32x32xbf16>
    %cst_10 = arith.constant dense<0.000000e+00> : vector<32x32xf32>
    %12 = tpu.matmul %3, %11, %cst_10 {dimension_numbers = #tpu.dot_dimension_numbers<[1], [0], [0], [1], [0, 0, 1, 1], [], []>} : vector<32x32xbf16>, vector<32x32xbf16>, vector<32x32xf32> -> vector<32x32xf32>
    %13 = arith.addf %10, %12 : vector<32x32xf32>
    %c32_11 = arith.constant 32 : index
    %c0_12 = arith.constant 0 : index
    %14 = vector.load %arg7[%c32_11, %c0_12] : memref<48x32xf32, #tpu.memory_space<vmem>>, vector<1x32xf32>
    %15 = vector.broadcast %14 : vector<1x32xf32> to vector<32x32xf32>
    %16 = arith.addf %13, %15 : vector<32x32xf32>
    %17 = arith.truncf %16 : vector<32x32xf32> to vector<32x32xbf16>
    %c0_13 = arith.constant 0 : index
    %c0_14 = arith.constant 0 : index
    %18 = vector.load %arg6[%c0_13, %c0_14] : memref<64x8xbf16, #tpu.memory_space<vmem>>, vector<32x8xbf16>
    %cst_15 = arith.constant dense<0.000000e+00> : vector<32x8xf32>
    %19 = tpu.matmul %17, %18, %cst_15 {dimension_numbers = #tpu.dot_dimension_numbers<[1], [0], [0], [1], [0, 0, 1, 1], [], []>} : vector<32x32xbf16>, vector<32x8xbf16>, vector<32x8xf32> -> vector<32x8xf32>
    %c41 = arith.constant 41 : index
    %c0_16 = arith.constant 0 : index
    %20 = vector.load %arg7[%c41, %c0_16] : memref<48x32xf32, #tpu.memory_space<vmem>>, vector<1x8xf32>
    %c42 = arith.constant 42 : index
    %c0_17 = arith.constant 0 : index
    %21 = vector.load %arg7[%c42, %c0_17] : memref<48x32xf32, #tpu.memory_space<vmem>>, vector<1x8xf32>
    %cst_18 = arith.constant dense<0.000000e+00> : vector<32xf32>
    %22 = vector.multi_reduction <add>, %19, %cst_18 [1] : vector<32x8xf32> to vector<32xf32>
    %23 = vector.shape_cast %22 : vector<32xf32> to vector<32x1xf32>
    %cst_19 = arith.constant 8.000000e+00 : f32
    %24 = vector.broadcast %cst_19 : f32 to vector<32x1xf32>
    %25 = arith.divf %23, %24 : vector<32x1xf32>
    %26 = vector.broadcast %25 : vector<32x1xf32> to vector<32x8xf32>
    %27 = arith.subf %19, %26 : vector<32x8xf32>
    %28 = arith.mulf %27, %27 : vector<32x8xf32>
    %cst_20 = arith.constant dense<0.000000e+00> : vector<32xf32>
    %29 = vector.multi_reduction <add>, %28, %cst_20 [1] : vector<32x8xf32> to vector<32xf32>
    %30 = vector.shape_cast %29 : vector<32xf32> to vector<32x1xf32>
    %cst_21 = arith.constant 8.000000e+00 : f32
    %31 = vector.broadcast %cst_21 : f32 to vector<32x1xf32>
    %32 = arith.divf %30, %31 : vector<32x1xf32>
    %33 = vector.broadcast %25 : vector<32x1xf32> to vector<32x8xf32>
    %34 = arith.subf %19, %33 : vector<32x8xf32>
    %cst_22 = arith.constant 9.99999974E-6 : f32
    %35 = vector.broadcast %cst_22 : f32 to vector<32x1xf32>
    %36 = arith.addf %32, %35 : vector<32x1xf32>
    %37 = math.rsqrt %36 : vector<32x1xf32>
    %38 = vector.broadcast %37 : vector<32x1xf32> to vector<32x8xf32>
    %39 = arith.mulf %34, %38 : vector<32x8xf32>
    %40 = vector.broadcast %20 : vector<1x8xf32> to vector<32x8xf32>
    %41 = arith.mulf %39, %40 : vector<32x8xf32>
    %42 = vector.broadcast %21 : vector<1x8xf32> to vector<32x8xf32>
    %43 = arith.addf %41, %42 : vector<32x8xf32>
    %c32_23 = arith.constant 32 : index
    %c0_24 = arith.constant 0 : index
    %44 = vector.load %arg6[%c32_23, %c0_24] : memref<64x8xbf16, #tpu.memory_space<vmem>>, vector<32x8xbf16>
    %cst_25 = arith.constant dense<0.000000e+00> : vector<32x8xf32>
    %45 = tpu.matmul %17, %44, %cst_25 {dimension_numbers = #tpu.dot_dimension_numbers<[1], [0], [0], [1], [0, 0, 1, 1], [], []>} : vector<32x32xbf16>, vector<32x8xbf16>, vector<32x8xf32> -> vector<32x8xf32>
    %c43 = arith.constant 43 : index
    %c0_26 = arith.constant 0 : index
    %46 = vector.load %arg7[%c43, %c0_26] : memref<48x32xf32, #tpu.memory_space<vmem>>, vector<1x8xf32>
    %c44 = arith.constant 44 : index
    %c0_27 = arith.constant 0 : index
    %47 = vector.load %arg7[%c44, %c0_27] : memref<48x32xf32, #tpu.memory_space<vmem>>, vector<1x8xf32>
    %cst_28 = arith.constant dense<0.000000e+00> : vector<32xf32>
    %48 = vector.multi_reduction <add>, %45, %cst_28 [1] : vector<32x8xf32> to vector<32xf32>
    %49 = vector.shape_cast %48 : vector<32xf32> to vector<32x1xf32>
    %cst_29 = arith.constant 8.000000e+00 : f32
    %50 = vector.broadcast %cst_29 : f32 to vector<32x1xf32>
    %51 = arith.divf %49, %50 : vector<32x1xf32>
    %52 = vector.broadcast %51 : vector<32x1xf32> to vector<32x8xf32>
    %53 = arith.subf %45, %52 : vector<32x8xf32>
    %54 = arith.mulf %53, %53 : vector<32x8xf32>
    %cst_30 = arith.constant dense<0.000000e+00> : vector<32xf32>
    %55 = vector.multi_reduction <add>, %54, %cst_30 [1] : vector<32x8xf32> to vector<32xf32>
    %56 = vector.shape_cast %55 : vector<32xf32> to vector<32x1xf32>
    %cst_31 = arith.constant 8.000000e+00 : f32
    %57 = vector.broadcast %cst_31 : f32 to vector<32x1xf32>
    %58 = arith.divf %56, %57 : vector<32x1xf32>
    %59 = vector.broadcast %51 : vector<32x1xf32> to vector<32x8xf32>
    %60 = arith.subf %45, %59 : vector<32x8xf32>
    %cst_32 = arith.constant 9.99999974E-6 : f32
    %61 = vector.broadcast %cst_32 : f32 to vector<32x1xf32>
    %62 = arith.addf %58, %61 : vector<32x1xf32>
    %63 = math.rsqrt %62 : vector<32x1xf32>
    %64 = vector.broadcast %63 : vector<32x1xf32> to vector<32x8xf32>
    %65 = arith.mulf %60, %64 : vector<32x8xf32>
    %66 = vector.broadcast %46 : vector<1x8xf32> to vector<32x8xf32>
    %67 = arith.mulf %65, %66 : vector<32x8xf32>
    %68 = vector.broadcast %47 : vector<1x8xf32> to vector<32x8xf32>
    %69 = arith.addf %67, %68 : vector<32x8xf32>
    %c0_33 = arith.constant 0 : index
    %c0_34 = arith.constant 0 : index
    %70 = vector.load %arg5[%c0_33, %c0_34] : memref<16x16xbf16, #tpu.memory_space<vmem>>, vector<16x16xbf16>
    %c39 = arith.constant 39 : index
    %c0_35 = arith.constant 0 : index
    %71 = vector.load %arg7[%c39, %c0_35] : memref<48x32xf32, #tpu.memory_space<vmem>>, vector<1x16xf32>
    %c40 = arith.constant 40 : index
    %c0_36 = arith.constant 0 : index
    %72 = vector.load %arg7[%c40, %c0_36] : memref<48x32xf32, #tpu.memory_space<vmem>>, vector<1x16xf32>
    %c0_37 = arith.constant 0 : index
    %c0_38 = arith.constant 0 : index
    %73 = vector.load %arg4[%c0_37, %c0_38] : memref<32x32xbf16, #tpu.memory_space<vmem>>, vector<16x32xbf16>
    %c16 = arith.constant 16 : index
    %c0_39 = arith.constant 0 : index
    %74 = vector.load %arg4[%c16, %c0_39] : memref<32x32xbf16, #tpu.memory_space<vmem>>, vector<16x32xbf16>
    %c37 = arith.constant 37 : index
    %c0_40 = arith.constant 0 : index
    %75 = vector.load %arg7[%c37, %c0_40] : memref<48x32xf32, #tpu.memory_space<vmem>>, vector<1x32xf32>
    %c38 = arith.constant 38 : index
    %c0_41 = arith.constant 0 : index
    %76 = vector.load %arg7[%c38, %c0_41] : memref<48x32xf32, #tpu.memory_space<vmem>>, vector<1x32xf32>
    %77 = vector.extract_strided_slice %43 {offsets = [0, 0], sizes = [16, 8], strides = [1, 1]} : vector<32x8xf32> to vector<16x8xf32>
    %78 = arith.truncf %77 : vector<16x8xf32> to vector<16x8xbf16>
    %79 = vector.extract_strided_slice %69 {offsets = [0, 0], sizes = [16, 8], strides = [1, 1]} : vector<32x8xf32> to vector<16x8xf32>
    %80 = arith.truncf %79 : vector<16x8xf32> to vector<16x8xbf16>
    %cst_42 = arith.constant dense<0.000000e+00> : vector<16x16xf32>
    %81 = tpu.matmul %78, %80, %cst_42 {dimension_numbers = #tpu.dot_dimension_numbers<[1], [1], [0], [0], [0, 0, 1, 0], [], []>} : vector<16x8xbf16>, vector<16x8xbf16>, vector<16x16xf32> -> vector<16x16xf32>
    %82 = arith.truncf %81 : vector<16x16xf32> to vector<16x16xbf16>
    %cst_43 = arith.constant dense<0.000000e+00> : vector<16x16xf32>
    %83 = tpu.matmul %82, %70, %cst_43 {dimension_numbers = #tpu.dot_dimension_numbers<[1], [0], [0], [1], [0, 0, 1, 1], [], []>} : vector<16x16xbf16>, vector<16x16xbf16>, vector<16x16xf32> -> vector<16x16xf32>
    %84 = vector.broadcast %71 : vector<1x16xf32> to vector<16x16xf32>
    %85 = arith.mulf %83, %84 : vector<16x16xf32>
    %86 = vector.broadcast %72 : vector<1x16xf32> to vector<16x16xf32>
    %87 = arith.addf %85, %86 : vector<16x16xf32>
    %88 = arith.addf %87, %81 : vector<16x16xf32>
    %89 = arith.truncf %88 : vector<16x16xf32> to vector<16x16xbf16>
    %cst_44 = arith.constant dense<0.000000e+00> : vector<16x32xf32>
    %90 = tpu.matmul %89, %73, %cst_44 {dimension_numbers = #tpu.dot_dimension_numbers<[1], [0], [0], [1], [0, 0, 1, 1], [], []>} : vector<16x16xbf16>, vector<16x32xbf16>, vector<16x32xf32> -> vector<16x32xf32>
    %cst_45 = arith.constant dense<0.000000e+00> : vector<16x32xf32>
    %91 = tpu.matmul %82, %74, %cst_45 {dimension_numbers = #tpu.dot_dimension_numbers<[1], [0], [0], [1], [0, 0, 1, 1], [], []>} : vector<16x16xbf16>, vector<16x32xbf16>, vector<16x32xf32> -> vector<16x32xf32>
    %92 = arith.addf %90, %91 : vector<16x32xf32>
    %93 = vector.broadcast %75 : vector<1x32xf32> to vector<16x32xf32>
    %94 = arith.mulf %92, %93 : vector<16x32xf32>
    %95 = vector.broadcast %76 : vector<1x32xf32> to vector<16x32xf32>
    %96 = arith.addf %94, %95 : vector<16x32xf32>
    %97 = vector.extract_strided_slice %43 {offsets = [16, 0], sizes = [16, 8], strides = [1, 1]} : vector<32x8xf32> to vector<16x8xf32>
    %98 = arith.truncf %97 : vector<16x8xf32> to vector<16x8xbf16>
    %99 = vector.extract_strided_slice %69 {offsets = [16, 0], sizes = [16, 8], strides = [1, 1]} : vector<32x8xf32> to vector<16x8xf32>
    %100 = arith.truncf %99 : vector<16x8xf32> to vector<16x8xbf16>
    %cst_46 = arith.constant dense<0.000000e+00> : vector<16x16xf32>
    %101 = tpu.matmul %98, %100, %cst_46 {dimension_numbers = #tpu.dot_dimension_numbers<[1], [1], [0], [0], [0, 0, 1, 0], [], []>} : vector<16x8xbf16>, vector<16x8xbf16>, vector<16x16xf32> -> vector<16x16xf32>
    %102 = arith.truncf %101 : vector<16x16xf32> to vector<16x16xbf16>
    %cst_47 = arith.constant dense<0.000000e+00> : vector<16x16xf32>
    %103 = tpu.matmul %102, %70, %cst_47 {dimension_numbers = #tpu.dot_dimension_numbers<[1], [0], [0], [1], [0, 0, 1, 1], [], []>} : vector<16x16xbf16>, vector<16x16xbf16>, vector<16x16xf32> -> vector<16x16xf32>
    %104 = vector.broadcast %71 : vector<1x16xf32> to vector<16x16xf32>
    %105 = arith.mulf %103, %104 : vector<16x16xf32>
    %106 = vector.broadcast %72 : vector<1x16xf32> to vector<16x16xf32>
    %107 = arith.addf %105, %106 : vector<16x16xf32>
    %108 = arith.addf %107, %101 : vector<16x16xf32>
    %109 = arith.truncf %108 : vector<16x16xf32> to vector<16x16xbf16>
    %cst_48 = arith.constant dense<0.000000e+00> : vector<16x32xf32>
    %110 = tpu.matmul %109, %73, %cst_48 {dimension_numbers = #tpu.dot_dimension_numbers<[1], [0], [0], [1], [0, 0, 1, 1], [], []>} : vector<16x16xbf16>, vector<16x32xbf16>, vector<16x32xf32> -> vector<16x32xf32>
    %cst_49 = arith.constant dense<0.000000e+00> : vector<16x32xf32>
    %111 = tpu.matmul %102, %74, %cst_49 {dimension_numbers = #tpu.dot_dimension_numbers<[1], [0], [0], [1], [0, 0, 1, 1], [], []>} : vector<16x16xbf16>, vector<16x32xbf16>, vector<16x32xf32> -> vector<16x32xf32>
    %112 = arith.addf %110, %111 : vector<16x32xf32>
    %113 = vector.broadcast %75 : vector<1x32xf32> to vector<16x32xf32>
    %114 = arith.mulf %112, %113 : vector<16x32xf32>
    %115 = vector.broadcast %76 : vector<1x32xf32> to vector<16x32xf32>
    %116 = arith.addf %114, %115 : vector<16x32xf32>
    %117 = tpu.concatenate %96, %116 in 0 : vector<16x32xf32>, vector<16x32xf32> -> vector<32x32xf32>
    %118 = arith.truncf %117 : vector<32x32xf32> to vector<32x32xbf16>
    %c96 = arith.constant 96 : index
    %c0_50 = arith.constant 0 : index
    %119 = vector.load %arg2[%c96, %c0_50] : memref<256x32xbf16, #tpu.memory_space<vmem>>, vector<32x32xbf16>
    %cst_51 = arith.constant dense<0.000000e+00> : vector<32x32xf32>
    %120 = tpu.matmul %118, %119, %cst_51 {dimension_numbers = #tpu.dot_dimension_numbers<[1], [0], [0], [1], [0, 0, 1, 1], [], []>} : vector<32x32xbf16>, vector<32x32xbf16>, vector<32x32xf32> -> vector<32x32xf32>
    %121 = arith.addf %16, %120 : vector<32x32xf32>
    %cst_52 = arith.constant 0.000000e+00 : f32
    %122 = vector.broadcast %cst_52 : f32 to vector<32x32xf32>
    %123 = arith.maximumf %121, %122 : vector<32x32xf32>
    %124 = arith.truncf %123 : vector<32x32xf32> to vector<32x32xbf16>
    %c0_53 = arith.constant 0 : index
    %c0_54 = arith.constant 0 : index
    %125 = vector.load %arg3[%c0_53, %c0_54] : memref<32x128xbf16, #tpu.memory_space<vmem>>, vector<32x128xbf16>
    %cst_55 = arith.constant dense<0.000000e+00> : vector<32x128xf32>
    %126 = tpu.matmul %124, %125, %cst_55 {dimension_numbers = #tpu.dot_dimension_numbers<[1], [0], [0], [1], [0, 0, 1, 1], [], []>} : vector<32x32xbf16>, vector<32x128xbf16>, vector<32x128xf32> -> vector<32x128xf32>
    %127 = vector.extract_strided_slice %126 {offsets = [0, 0], sizes = [32, 32], strides = [1, 1]} : vector<32x128xf32> to vector<32x32xf32>
    %128 = arith.truncf %127 : vector<32x32xf32> to vector<32x32xbf16>
    %129 = vector.extract_strided_slice %126 {offsets = [0, 32], sizes = [32, 32], strides = [1, 1]} : vector<32x128xf32> to vector<32x32xf32>
    %130 = arith.truncf %129 : vector<32x32xf32> to vector<32x32xbf16>
    %131 = vector.extract_strided_slice %126 {offsets = [0, 64], sizes = [32, 32], strides = [1, 1]} : vector<32x128xf32> to vector<32x32xf32>
    %132 = arith.truncf %131 : vector<32x32xf32> to vector<32x32xbf16>
    %133 = vector.extract_strided_slice %126 {offsets = [0, 96], sizes = [32, 32], strides = [1, 1]} : vector<32x128xf32> to vector<32x32xf32>
    %134 = arith.truncf %133 : vector<32x32xf32> to vector<32x32xbf16>
    %c128 = arith.constant 128 : index
    %c0_56 = arith.constant 0 : index
    %135 = vector.load %arg2[%c128, %c0_56] : memref<256x32xbf16, #tpu.memory_space<vmem>>, vector<32x32xbf16>
    %cst_57 = arith.constant dense<0.000000e+00> : vector<32x32xf32>
    %136 = tpu.matmul %8, %135, %cst_57 {dimension_numbers = #tpu.dot_dimension_numbers<[1], [0], [0], [1], [0, 0, 1, 1], [], []>} : vector<32x32xbf16>, vector<32x32xbf16>, vector<32x32xf32> -> vector<32x32xf32>
    %c33 = arith.constant 33 : index
    %c0_58 = arith.constant 0 : index
    %137 = vector.load %arg7[%c33, %c0_58] : memref<48x32xf32, #tpu.memory_space<vmem>>, vector<1x32xf32>
    %138 = vector.broadcast %137 : vector<1x32xf32> to vector<32x32xf32>
    %139 = arith.addf %136, %138 : vector<32x32xf32>
    %140 = arith.truncf %139 : vector<32x32xf32> to vector<32x32xbf16>
    %c160 = arith.constant 160 : index
    %c0_59 = arith.constant 0 : index
    %141 = vector.load %arg2[%c160, %c0_59] : memref<256x32xbf16, #tpu.memory_space<vmem>>, vector<32x32xbf16>
    %cst_60 = arith.constant dense<0.000000e+00> : vector<32x32xf32>
    %142 = tpu.matmul %3, %141, %cst_60 {dimension_numbers = #tpu.dot_dimension_numbers<[1], [0], [0], [1], [0, 0, 1, 1], [], []>} : vector<32x32xbf16>, vector<32x32xbf16>, vector<32x32xf32> -> vector<32x32xf32>
    %c34 = arith.constant 34 : index
    %c0_61 = arith.constant 0 : index
    %143 = vector.load %arg7[%c34, %c0_61] : memref<48x32xf32, #tpu.memory_space<vmem>>, vector<1x32xf32>
    %144 = vector.broadcast %143 : vector<1x32xf32> to vector<32x32xf32>
    %145 = arith.addf %142, %144 : vector<32x32xf32>
    %146 = arith.truncf %145 : vector<32x32xf32> to vector<32x32xbf16>
    %147 = vector.extract_strided_slice %140 {offsets = [0, 0], sizes = [16, 8], strides = [1, 1]} : vector<32x32xbf16> to vector<16x8xbf16>
    %148 = vector.extract_strided_slice %140 {offsets = [0, 8], sizes = [16, 8], strides = [1, 1]} : vector<32x32xbf16> to vector<16x8xbf16>
    %149 = vector.extract_strided_slice %140 {offsets = [0, 16], sizes = [16, 8], strides = [1, 1]} : vector<32x32xbf16> to vector<16x8xbf16>
    %150 = vector.extract_strided_slice %140 {offsets = [0, 24], sizes = [16, 8], strides = [1, 1]} : vector<32x32xbf16> to vector<16x8xbf16>
    %151 = vector.extract_strided_slice %140 {offsets = [16, 0], sizes = [16, 8], strides = [1, 1]} : vector<32x32xbf16> to vector<16x8xbf16>
    %152 = vector.extract_strided_slice %140 {offsets = [16, 8], sizes = [16, 8], strides = [1, 1]} : vector<32x32xbf16> to vector<16x8xbf16>
    %153 = vector.extract_strided_slice %140 {offsets = [16, 16], sizes = [16, 8], strides = [1, 1]} : vector<32x32xbf16> to vector<16x8xbf16>
    %154 = vector.extract_strided_slice %140 {offsets = [16, 24], sizes = [16, 8], strides = [1, 1]} : vector<32x32xbf16> to vector<16x8xbf16>
    %155 = vector.shape_cast %147 : vector<16x8xbf16> to vector<1x16x8xbf16>
    %156 = vector.shape_cast %148 : vector<16x8xbf16> to vector<1x16x8xbf16>
    %157 = vector.shape_cast %149 : vector<16x8xbf16> to vector<1x16x8xbf16>
    %158 = vector.shape_cast %150 : vector<16x8xbf16> to vector<1x16x8xbf16>
    %159 = vector.shape_cast %151 : vector<16x8xbf16> to vector<1x16x8xbf16>
    %160 = vector.shape_cast %152 : vector<16x8xbf16> to vector<1x16x8xbf16>
    %161 = vector.shape_cast %153 : vector<16x8xbf16> to vector<1x16x8xbf16>
    %162 = vector.shape_cast %154 : vector<16x8xbf16> to vector<1x16x8xbf16>
    %163 = tpu.concatenate %155, %156, %157, %158, %159, %160, %161, %162 in 0 : vector<1x16x8xbf16>, vector<1x16x8xbf16>, vector<1x16x8xbf16>, vector<1x16x8xbf16>, vector<1x16x8xbf16>, vector<1x16x8xbf16>, vector<1x16x8xbf16>, vector<1x16x8xbf16> -> vector<8x16x8xbf16>
    %164 = vector.extract_strided_slice %128 {offsets = [0, 0], sizes = [16, 8], strides = [1, 1]} : vector<32x32xbf16> to vector<16x8xbf16>
    %165 = vector.extract_strided_slice %128 {offsets = [0, 8], sizes = [16, 8], strides = [1, 1]} : vector<32x32xbf16> to vector<16x8xbf16>
    %166 = vector.extract_strided_slice %128 {offsets = [0, 16], sizes = [16, 8], strides = [1, 1]} : vector<32x32xbf16> to vector<16x8xbf16>
    %167 = vector.extract_strided_slice %128 {offsets = [0, 24], sizes = [16, 8], strides = [1, 1]} : vector<32x32xbf16> to vector<16x8xbf16>
    %168 = vector.extract_strided_slice %128 {offsets = [16, 0], sizes = [16, 8], strides = [1, 1]} : vector<32x32xbf16> to vector<16x8xbf16>
    %169 = vector.extract_strided_slice %128 {offsets = [16, 8], sizes = [16, 8], strides = [1, 1]} : vector<32x32xbf16> to vector<16x8xbf16>
    %170 = vector.extract_strided_slice %128 {offsets = [16, 16], sizes = [16, 8], strides = [1, 1]} : vector<32x32xbf16> to vector<16x8xbf16>
    %171 = vector.extract_strided_slice %128 {offsets = [16, 24], sizes = [16, 8], strides = [1, 1]} : vector<32x32xbf16> to vector<16x8xbf16>
    %172 = vector.shape_cast %164 : vector<16x8xbf16> to vector<1x16x8xbf16>
    %173 = vector.shape_cast %165 : vector<16x8xbf16> to vector<1x16x8xbf16>
    %174 = vector.shape_cast %166 : vector<16x8xbf16> to vector<1x16x8xbf16>
    %175 = vector.shape_cast %167 : vector<16x8xbf16> to vector<1x16x8xbf16>
    %176 = vector.shape_cast %168 : vector<16x8xbf16> to vector<1x16x8xbf16>
    %177 = vector.shape_cast %169 : vector<16x8xbf16> to vector<1x16x8xbf16>
    %178 = vector.shape_cast %170 : vector<16x8xbf16> to vector<1x16x8xbf16>
    %179 = vector.shape_cast %171 : vector<16x8xbf16> to vector<1x16x8xbf16>
    %180 = tpu.concatenate %172, %173, %174, %175, %176, %177, %178, %179 in 0 : vector<1x16x8xbf16>, vector<1x16x8xbf16>, vector<1x16x8xbf16>, vector<1x16x8xbf16>, vector<1x16x8xbf16>, vector<1x16x8xbf16>, vector<1x16x8xbf16>, vector<1x16x8xbf16> -> vector<8x16x8xbf16>
    %181 = vector.extract_strided_slice %130 {offsets = [0, 0], sizes = [16, 8], strides = [1, 1]} : vector<32x32xbf16> to vector<16x8xbf16>
    %182 = vector.extract_strided_slice %130 {offsets = [0, 8], sizes = [16, 8], strides = [1, 1]} : vector<32x32xbf16> to vector<16x8xbf16>
    %183 = vector.extract_strided_slice %130 {offsets = [0, 16], sizes = [16, 8], strides = [1, 1]} : vector<32x32xbf16> to vector<16x8xbf16>
    %184 = vector.extract_strided_slice %130 {offsets = [0, 24], sizes = [16, 8], strides = [1, 1]} : vector<32x32xbf16> to vector<16x8xbf16>
    %185 = vector.extract_strided_slice %130 {offsets = [16, 0], sizes = [16, 8], strides = [1, 1]} : vector<32x32xbf16> to vector<16x8xbf16>
    %186 = vector.extract_strided_slice %130 {offsets = [16, 8], sizes = [16, 8], strides = [1, 1]} : vector<32x32xbf16> to vector<16x8xbf16>
    %187 = vector.extract_strided_slice %130 {offsets = [16, 16], sizes = [16, 8], strides = [1, 1]} : vector<32x32xbf16> to vector<16x8xbf16>
    %188 = vector.extract_strided_slice %130 {offsets = [16, 24], sizes = [16, 8], strides = [1, 1]} : vector<32x32xbf16> to vector<16x8xbf16>
    %189 = vector.shape_cast %181 : vector<16x8xbf16> to vector<1x16x8xbf16>
    %190 = vector.shape_cast %182 : vector<16x8xbf16> to vector<1x16x8xbf16>
    %191 = vector.shape_cast %183 : vector<16x8xbf16> to vector<1x16x8xbf16>
    %192 = vector.shape_cast %184 : vector<16x8xbf16> to vector<1x16x8xbf16>
    %193 = vector.shape_cast %185 : vector<16x8xbf16> to vector<1x16x8xbf16>
    %194 = vector.shape_cast %186 : vector<16x8xbf16> to vector<1x16x8xbf16>
    %195 = vector.shape_cast %187 : vector<16x8xbf16> to vector<1x16x8xbf16>
    %196 = vector.shape_cast %188 : vector<16x8xbf16> to vector<1x16x8xbf16>
    %197 = tpu.concatenate %189, %190, %191, %192, %193, %194, %195, %196 in 0 : vector<1x16x8xbf16>, vector<1x16x8xbf16>, vector<1x16x8xbf16>, vector<1x16x8xbf16>, vector<1x16x8xbf16>, vector<1x16x8xbf16>, vector<1x16x8xbf16>, vector<1x16x8xbf16> -> vector<8x16x8xbf16>
    "tpu.trace_start"() <{level = 10 : i32, message = "gqd,gkd->gqk"}> : () -> ()
    %cst_62 = arith.constant dense<0.000000e+00> : vector<8x16x16xf32>
    %198 = tpu.matmul %163, %180, %cst_62 {dimension_numbers = #tpu.dot_dimension_numbers<[2], [2], [1], [1], [0, 0, 0, 1, 1, 1], [0], [0]>} : vector<8x16x8xbf16>, vector<8x16x8xbf16>, vector<8x16x16xf32> -> vector<8x16x16xf32>
    "tpu.trace_stop"() : () -> ()
    %cst_63 = arith.constant dense<0xFF800000> : vector<8x16xf32>
    %199 = vector.multi_reduction <maximumf>, %198, %cst_63 [2] : vector<8x16x16xf32> to vector<8x16xf32>
    %200 = vector.shape_cast %199 : vector<8x16xf32> to vector<8x16x1xf32>
    %201 = vector.broadcast %200 : vector<8x16x1xf32> to vector<8x16x16xf32>
    %202 = arith.subf %198, %201 : vector<8x16x16xf32>
    %203 = math.exp %202 : vector<8x16x16xf32>
    %cst_64 = arith.constant dense<0.000000e+00> : vector<8x16xf32>
    %204 = vector.multi_reduction <add>, %203, %cst_64 [2] : vector<8x16x16xf32> to vector<8x16xf32>
    %205 = vector.shape_cast %204 : vector<8x16xf32> to vector<8x16x1xf32>
    %206 = tpu.reciprocal %205 {approx = true} : vector<8x16x1xf32> -> vector<8x16x1xf32>
    %207 = vector.broadcast %206 : vector<8x16x1xf32> to vector<8x16x16xf32>
    %208 = arith.mulf %203, %207 : vector<8x16x16xf32>
    %209 = arith.truncf %208 : vector<8x16x16xf32> to vector<8x16x16xbf16>
    "tpu.trace_start"() <{level = 10 : i32, message = "gqk,gkd->gqd"}> : () -> ()
    %cst_65 = arith.constant dense<0.000000e+00> : vector<8x16x8xf32>
    %210 = tpu.matmul %209, %197, %cst_65 {dimension_numbers = #tpu.dot_dimension_numbers<[2], [1], [1], [2], [0, 0, 0, 1, 1, 2], [0], [0]>} : vector<8x16x16xbf16>, vector<8x16x8xbf16>, vector<8x16x8xf32> -> vector<8x16x8xf32>
    "tpu.trace_stop"() : () -> ()
    %211 = vector.extract_strided_slice %210 {offsets = [0, 0, 0], sizes = [1, 16, 8], strides = [1, 1, 1]} : vector<8x16x8xf32> to vector<1x16x8xf32>
    %212 = vector.shape_cast %211 : vector<1x16x8xf32> to vector<16x8xf32>
    %213 = vector.extract_strided_slice %210 {offsets = [1, 0, 0], sizes = [1, 16, 8], strides = [1, 1, 1]} : vector<8x16x8xf32> to vector<1x16x8xf32>
    %214 = vector.shape_cast %213 : vector<1x16x8xf32> to vector<16x8xf32>
    %215 = vector.extract_strided_slice %210 {offsets = [2, 0, 0], sizes = [1, 16, 8], strides = [1, 1, 1]} : vector<8x16x8xf32> to vector<1x16x8xf32>
    %216 = vector.shape_cast %215 : vector<1x16x8xf32> to vector<16x8xf32>
    %217 = vector.extract_strided_slice %210 {offsets = [3, 0, 0], sizes = [1, 16, 8], strides = [1, 1, 1]} : vector<8x16x8xf32> to vector<1x16x8xf32>
    %218 = vector.shape_cast %217 : vector<1x16x8xf32> to vector<16x8xf32>
    %219 = tpu.concatenate %212, %214, %216, %218 in 1 : vector<16x8xf32>, vector<16x8xf32>, vector<16x8xf32>, vector<16x8xf32> -> vector<16x32xf32>
    %220 = vector.extract_strided_slice %210 {offsets = [4, 0, 0], sizes = [1, 16, 8], strides = [1, 1, 1]} : vector<8x16x8xf32> to vector<1x16x8xf32>
    %221 = vector.shape_cast %220 : vector<1x16x8xf32> to vector<16x8xf32>
    %222 = vector.extract_strided_slice %210 {offsets = [5, 0, 0], sizes = [1, 16, 8], strides = [1, 1, 1]} : vector<8x16x8xf32> to vector<1x16x8xf32>
    %223 = vector.shape_cast %222 : vector<1x16x8xf32> to vector<16x8xf32>
    %224 = vector.extract_strided_slice %210 {offsets = [6, 0, 0], sizes = [1, 16, 8], strides = [1, 1, 1]} : vector<8x16x8xf32> to vector<1x16x8xf32>
    %225 = vector.shape_cast %224 : vector<1x16x8xf32> to vector<16x8xf32>
    %226 = vector.extract_strided_slice %210 {offsets = [7, 0, 0], sizes = [1, 16, 8], strides = [1, 1, 1]} : vector<8x16x8xf32> to vector<1x16x8xf32>
    %227 = vector.shape_cast %226 : vector<1x16x8xf32> to vector<16x8xf32>
    %228 = tpu.concatenate %221, %223, %225, %227 in 1 : vector<16x8xf32>, vector<16x8xf32>, vector<16x8xf32>, vector<16x8xf32> -> vector<16x32xf32>
    %229 = tpu.concatenate %219, %228 in 0 : vector<16x32xf32>, vector<16x32xf32> -> vector<32x32xf32>
    %230 = vector.extract_strided_slice %146 {offsets = [0, 0], sizes = [16, 8], strides = [1, 1]} : vector<32x32xbf16> to vector<16x8xbf16>
    %231 = vector.extract_strided_slice %146 {offsets = [0, 8], sizes = [16, 8], strides = [1, 1]} : vector<32x32xbf16> to vector<16x8xbf16>
    %232 = vector.extract_strided_slice %146 {offsets = [0, 16], sizes = [16, 8], strides = [1, 1]} : vector<32x32xbf16> to vector<16x8xbf16>
    %233 = vector.extract_strided_slice %146 {offsets = [0, 24], sizes = [16, 8], strides = [1, 1]} : vector<32x32xbf16> to vector<16x8xbf16>
    %234 = vector.extract_strided_slice %146 {offsets = [16, 0], sizes = [16, 8], strides = [1, 1]} : vector<32x32xbf16> to vector<16x8xbf16>
    %235 = vector.extract_strided_slice %146 {offsets = [16, 8], sizes = [16, 8], strides = [1, 1]} : vector<32x32xbf16> to vector<16x8xbf16>
    %236 = vector.extract_strided_slice %146 {offsets = [16, 16], sizes = [16, 8], strides = [1, 1]} : vector<32x32xbf16> to vector<16x8xbf16>
    %237 = vector.extract_strided_slice %146 {offsets = [16, 24], sizes = [16, 8], strides = [1, 1]} : vector<32x32xbf16> to vector<16x8xbf16>
    %238 = vector.shape_cast %230 : vector<16x8xbf16> to vector<1x16x8xbf16>
    %239 = vector.shape_cast %231 : vector<16x8xbf16> to vector<1x16x8xbf16>
    %240 = vector.shape_cast %232 : vector<16x8xbf16> to vector<1x16x8xbf16>
    %241 = vector.shape_cast %233 : vector<16x8xbf16> to vector<1x16x8xbf16>
    %242 = vector.shape_cast %234 : vector<16x8xbf16> to vector<1x16x8xbf16>
    %243 = vector.shape_cast %235 : vector<16x8xbf16> to vector<1x16x8xbf16>
    %244 = vector.shape_cast %236 : vector<16x8xbf16> to vector<1x16x8xbf16>
    %245 = vector.shape_cast %237 : vector<16x8xbf16> to vector<1x16x8xbf16>
    %246 = tpu.concatenate %238, %239, %240, %241, %242, %243, %244, %245 in 0 : vector<1x16x8xbf16>, vector<1x16x8xbf16>, vector<1x16x8xbf16>, vector<1x16x8xbf16>, vector<1x16x8xbf16>, vector<1x16x8xbf16>, vector<1x16x8xbf16>, vector<1x16x8xbf16> -> vector<8x16x8xbf16>
    %247 = vector.extract_strided_slice %132 {offsets = [0, 0], sizes = [16, 8], strides = [1, 1]} : vector<32x32xbf16> to vector<16x8xbf16>
    %248 = vector.extract_strided_slice %132 {offsets = [0, 8], sizes = [16, 8], strides = [1, 1]} : vector<32x32xbf16> to vector<16x8xbf16>
    %249 = vector.extract_strided_slice %132 {offsets = [0, 16], sizes = [16, 8], strides = [1, 1]} : vector<32x32xbf16> to vector<16x8xbf16>
    %250 = vector.extract_strided_slice %132 {offsets = [0, 24], sizes = [16, 8], strides = [1, 1]} : vector<32x32xbf16> to vector<16x8xbf16>
    %251 = vector.extract_strided_slice %132 {offsets = [16, 0], sizes = [16, 8], strides = [1, 1]} : vector<32x32xbf16> to vector<16x8xbf16>
    %252 = vector.extract_strided_slice %132 {offsets = [16, 8], sizes = [16, 8], strides = [1, 1]} : vector<32x32xbf16> to vector<16x8xbf16>
    %253 = vector.extract_strided_slice %132 {offsets = [16, 16], sizes = [16, 8], strides = [1, 1]} : vector<32x32xbf16> to vector<16x8xbf16>
    %254 = vector.extract_strided_slice %132 {offsets = [16, 24], sizes = [16, 8], strides = [1, 1]} : vector<32x32xbf16> to vector<16x8xbf16>
    %255 = vector.shape_cast %247 : vector<16x8xbf16> to vector<1x16x8xbf16>
    %256 = vector.shape_cast %248 : vector<16x8xbf16> to vector<1x16x8xbf16>
    %257 = vector.shape_cast %249 : vector<16x8xbf16> to vector<1x16x8xbf16>
    %258 = vector.shape_cast %250 : vector<16x8xbf16> to vector<1x16x8xbf16>
    %259 = vector.shape_cast %251 : vector<16x8xbf16> to vector<1x16x8xbf16>
    %260 = vector.shape_cast %252 : vector<16x8xbf16> to vector<1x16x8xbf16>
    %261 = vector.shape_cast %253 : vector<16x8xbf16> to vector<1x16x8xbf16>
    %262 = vector.shape_cast %254 : vector<16x8xbf16> to vector<1x16x8xbf16>
    %263 = tpu.concatenate %255, %256, %257, %258, %259, %260, %261, %262 in 0 : vector<1x16x8xbf16>, vector<1x16x8xbf16>, vector<1x16x8xbf16>, vector<1x16x8xbf16>, vector<1x16x8xbf16>, vector<1x16x8xbf16>, vector<1x16x8xbf16>, vector<1x16x8xbf16> -> vector<8x16x8xbf16>
    %264 = vector.extract_strided_slice %134 {offsets = [0, 0], sizes = [16, 8], strides = [1, 1]} : vector<32x32xbf16> to vector<16x8xbf16>
    %265 = vector.extract_strided_slice %134 {offsets = [0, 8], sizes = [16, 8], strides = [1, 1]} : vector<32x32xbf16> to vector<16x8xbf16>
    %266 = vector.extract_strided_slice %134 {offsets = [0, 16], sizes = [16, 8], strides = [1, 1]} : vector<32x32xbf16> to vector<16x8xbf16>
    %267 = vector.extract_strided_slice %134 {offsets = [0, 24], sizes = [16, 8], strides = [1, 1]} : vector<32x32xbf16> to vector<16x8xbf16>
    %268 = vector.extract_strided_slice %134 {offsets = [16, 0], sizes = [16, 8], strides = [1, 1]} : vector<32x32xbf16> to vector<16x8xbf16>
    %269 = vector.extract_strided_slice %134 {offsets = [16, 8], sizes = [16, 8], strides = [1, 1]} : vector<32x32xbf16> to vector<16x8xbf16>
    %270 = vector.extract_strided_slice %134 {offsets = [16, 16], sizes = [16, 8], strides = [1, 1]} : vector<32x32xbf16> to vector<16x8xbf16>
    %271 = vector.extract_strided_slice %134 {offsets = [16, 24], sizes = [16, 8], strides = [1, 1]} : vector<32x32xbf16> to vector<16x8xbf16>
    %272 = vector.shape_cast %264 : vector<16x8xbf16> to vector<1x16x8xbf16>
    %273 = vector.shape_cast %265 : vector<16x8xbf16> to vector<1x16x8xbf16>
    %274 = vector.shape_cast %266 : vector<16x8xbf16> to vector<1x16x8xbf16>
    %275 = vector.shape_cast %267 : vector<16x8xbf16> to vector<1x16x8xbf16>
    %276 = vector.shape_cast %268 : vector<16x8xbf16> to vector<1x16x8xbf16>
    %277 = vector.shape_cast %269 : vector<16x8xbf16> to vector<1x16x8xbf16>
    %278 = vector.shape_cast %270 : vector<16x8xbf16> to vector<1x16x8xbf16>
    %279 = vector.shape_cast %271 : vector<16x8xbf16> to vector<1x16x8xbf16>
    %280 = tpu.concatenate %272, %273, %274, %275, %276, %277, %278, %279 in 0 : vector<1x16x8xbf16>, vector<1x16x8xbf16>, vector<1x16x8xbf16>, vector<1x16x8xbf16>, vector<1x16x8xbf16>, vector<1x16x8xbf16>, vector<1x16x8xbf16>, vector<1x16x8xbf16> -> vector<8x16x8xbf16>
    "tpu.trace_start"() <{level = 10 : i32, message = "gqd,gkd->gqk"}> : () -> ()
    %cst_66 = arith.constant dense<0.000000e+00> : vector<8x16x16xf32>
    %281 = tpu.matmul %246, %263, %cst_66 {dimension_numbers = #tpu.dot_dimension_numbers<[2], [2], [1], [1], [0, 0, 0, 1, 1, 1], [0], [0]>} : vector<8x16x8xbf16>, vector<8x16x8xbf16>, vector<8x16x16xf32> -> vector<8x16x16xf32>
    "tpu.trace_stop"() : () -> ()
    %cst_67 = arith.constant dense<0xFF800000> : vector<8x16xf32>
    %282 = vector.multi_reduction <maximumf>, %281, %cst_67 [2] : vector<8x16x16xf32> to vector<8x16xf32>
    %283 = vector.shape_cast %282 : vector<8x16xf32> to vector<8x16x1xf32>
    %284 = vector.broadcast %283 : vector<8x16x1xf32> to vector<8x16x16xf32>
    %285 = arith.subf %281, %284 : vector<8x16x16xf32>
    %286 = math.exp %285 : vector<8x16x16xf32>
    %cst_68 = arith.constant dense<0.000000e+00> : vector<8x16xf32>
    %287 = vector.multi_reduction <add>, %286, %cst_68 [2] : vector<8x16x16xf32> to vector<8x16xf32>
    %288 = vector.shape_cast %287 : vector<8x16xf32> to vector<8x16x1xf32>
    %289 = tpu.reciprocal %288 {approx = true} : vector<8x16x1xf32> -> vector<8x16x1xf32>
    %290 = vector.broadcast %289 : vector<8x16x1xf32> to vector<8x16x16xf32>
    %291 = arith.mulf %286, %290 : vector<8x16x16xf32>
    %292 = arith.truncf %291 : vector<8x16x16xf32> to vector<8x16x16xbf16>
    "tpu.trace_start"() <{level = 10 : i32, message = "gqk,gkd->gqd"}> : () -> ()
    %cst_69 = arith.constant dense<0.000000e+00> : vector<8x16x8xf32>
    %293 = tpu.matmul %292, %280, %cst_69 {dimension_numbers = #tpu.dot_dimension_numbers<[2], [1], [1], [2], [0, 0, 0, 1, 1, 2], [0], [0]>} : vector<8x16x16xbf16>, vector<8x16x8xbf16>, vector<8x16x8xf32> -> vector<8x16x8xf32>
    "tpu.trace_stop"() : () -> ()
    %294 = vector.extract_strided_slice %293 {offsets = [0, 0, 0], sizes = [1, 16, 8], strides = [1, 1, 1]} : vector<8x16x8xf32> to vector<1x16x8xf32>
    %295 = vector.shape_cast %294 : vector<1x16x8xf32> to vector<16x8xf32>
    %296 = vector.extract_strided_slice %293 {offsets = [1, 0, 0], sizes = [1, 16, 8], strides = [1, 1, 1]} : vector<8x16x8xf32> to vector<1x16x8xf32>
    %297 = vector.shape_cast %296 : vector<1x16x8xf32> to vector<16x8xf32>
    %298 = vector.extract_strided_slice %293 {offsets = [2, 0, 0], sizes = [1, 16, 8], strides = [1, 1, 1]} : vector<8x16x8xf32> to vector<1x16x8xf32>
    %299 = vector.shape_cast %298 : vector<1x16x8xf32> to vector<16x8xf32>
    %300 = vector.extract_strided_slice %293 {offsets = [3, 0, 0], sizes = [1, 16, 8], strides = [1, 1, 1]} : vector<8x16x8xf32> to vector<1x16x8xf32>
    %301 = vector.shape_cast %300 : vector<1x16x8xf32> to vector<16x8xf32>
    %302 = tpu.concatenate %295, %297, %299, %301 in 1 : vector<16x8xf32>, vector<16x8xf32>, vector<16x8xf32>, vector<16x8xf32> -> vector<16x32xf32>
    %303 = vector.extract_strided_slice %293 {offsets = [4, 0, 0], sizes = [1, 16, 8], strides = [1, 1, 1]} : vector<8x16x8xf32> to vector<1x16x8xf32>
    %304 = vector.shape_cast %303 : vector<1x16x8xf32> to vector<16x8xf32>
    %305 = vector.extract_strided_slice %293 {offsets = [5, 0, 0], sizes = [1, 16, 8], strides = [1, 1, 1]} : vector<8x16x8xf32> to vector<1x16x8xf32>
    %306 = vector.shape_cast %305 : vector<1x16x8xf32> to vector<16x8xf32>
    %307 = vector.extract_strided_slice %293 {offsets = [6, 0, 0], sizes = [1, 16, 8], strides = [1, 1, 1]} : vector<8x16x8xf32> to vector<1x16x8xf32>
    %308 = vector.shape_cast %307 : vector<1x16x8xf32> to vector<16x8xf32>
    %309 = vector.extract_strided_slice %293 {offsets = [7, 0, 0], sizes = [1, 16, 8], strides = [1, 1, 1]} : vector<8x16x8xf32> to vector<1x16x8xf32>
    %310 = vector.shape_cast %309 : vector<1x16x8xf32> to vector<16x8xf32>
    %311 = tpu.concatenate %304, %306, %308, %310 in 1 : vector<16x8xf32>, vector<16x8xf32>, vector<16x8xf32>, vector<16x8xf32> -> vector<16x32xf32>
    %312 = tpu.concatenate %302, %311 in 0 : vector<16x32xf32>, vector<16x32xf32> -> vector<32x32xf32>
    %313 = arith.truncf %229 : vector<32x32xf32> to vector<32x32xbf16>
    %c192 = arith.constant 192 : index
    %c0_70 = arith.constant 0 : index
    %314 = vector.load %arg2[%c192, %c0_70] : memref<256x32xbf16, #tpu.memory_space<vmem>>, vector<32x32xbf16>
    %cst_71 = arith.constant dense<0.000000e+00> : vector<32x32xf32>
    %315 = tpu.matmul %313, %314, %cst_71 {dimension_numbers = #tpu.dot_dimension_numbers<[1], [0], [0], [1], [0, 0, 1, 1], [], []>} : vector<32x32xbf16>, vector<32x32xbf16>, vector<32x32xf32> -> vector<32x32xf32>
    %c35 = arith.constant 35 : index
    %c0_72 = arith.constant 0 : index
    %316 = vector.load %arg7[%c35, %c0_72] : memref<48x32xf32, #tpu.memory_space<vmem>>, vector<1x32xf32>
    %317 = vector.broadcast %316 : vector<1x32xf32> to vector<32x32xf32>
    %318 = arith.addf %315, %317 : vector<32x32xf32>
    %319 = arith.truncf %312 : vector<32x32xf32> to vector<32x32xbf16>
    %c224 = arith.constant 224 : index
    %c0_73 = arith.constant 0 : index
    %320 = vector.load %arg2[%c224, %c0_73] : memref<256x32xbf16, #tpu.memory_space<vmem>>, vector<32x32xbf16>
    %cst_74 = arith.constant dense<0.000000e+00> : vector<32x32xf32>
    %321 = tpu.matmul %319, %320, %cst_74 {dimension_numbers = #tpu.dot_dimension_numbers<[1], [0], [0], [1], [0, 0, 1, 1], [], []>} : vector<32x32xbf16>, vector<32x32xbf16>, vector<32x32xf32> -> vector<32x32xf32>
    %c36 = arith.constant 36 : index
    %c0_75 = arith.constant 0 : index
    %322 = vector.load %arg7[%c36, %c0_75] : memref<48x32xf32, #tpu.memory_space<vmem>>, vector<1x32xf32>
    %323 = vector.broadcast %322 : vector<1x32xf32> to vector<32x32xf32>
    %324 = arith.addf %321, %323 : vector<32x32xf32>
    %c0_76 = arith.constant 0 : index
    %c0_77 = arith.constant 0 : index
    %c0_78 = arith.constant 0 : index
    %325 = vector.load %arg8[%c0_76, %c0_77, %c0_78] : memref<2x32x32xf32, #tpu.memory_space<vmem>>, vector<1x32x32xf32>
    %326 = vector.shape_cast %325 : vector<1x32x32xf32> to vector<32x32xf32>
    %327 = vector.shape_cast %324 : vector<32x32xf32> to vector<1x32x32xf32>
    tpu.vector_store %arg8[%c0_76, %c0_77, %c0_78], %327 {strides = array<i32>} : memref<2x32x32xf32, #tpu.memory_space<vmem>>, vector<1x32x32xf32>,
    %c1 = arith.constant 1 : index
    %c0_79 = arith.constant 0 : index
    %c0_80 = arith.constant 0 : index
    %328 = vector.load %arg8[%c1, %c0_79, %c0_80] : memref<2x32x32xf32, #tpu.memory_space<vmem>>, vector<1x32x32xf32>
    %329 = vector.shape_cast %328 : vector<1x32x32xf32> to vector<32x32xf32>
    %330 = vector.shape_cast %318 : vector<32x32xf32> to vector<1x32x32xf32>
    tpu.vector_store %arg8[%c1, %c0_79, %c0_80], %330 {strides = array<i32>} : memref<2x32x32xf32, #tpu.memory_space<vmem>>, vector<1x32x32xf32>,
    return
  }
  func.func @transform_0(%arg0: i32) -> (i32, i32) {
    %c0_i32 = arith.constant 0 : i32
    %c0_i32_0 = arith.constant 0 : i32
    %c0_i32_1 = arith.constant 0 : i32
    return %c0_i32, %c0_i32_0 : i32, i32
  }
  func.func @transform_1(%arg0: i32) -> (i32, i32) {
    %c0_i32 = arith.constant 0 : i32
    %c0_i32_0 = arith.constant 0 : i32
    %c0_i32_1 = arith.constant 0 : i32
    return %c0_i32, %c0_i32_0 : i32, i32
  }
  func.func @transform_2(%arg0: i32) -> (i32, i32) {
    %c0_i32 = arith.constant 0 : i32
    %c0_i32_0 = arith.constant 0 : i32
    %c0_i32_1 = arith.constant 0 : i32
    return %c0_i32, %c0_i32_0 : i32, i32
  }
  func.func @transform_3(%arg0: i32) -> (i32, i32) {
    %c0_i32 = arith.constant 0 : i32
    %c0_i32_0 = arith.constant 0 : i32
    %c0_i32_1 = arith.constant 0 : i32
    return %c0_i32, %c0_i32_0 : i32, i32
  }
  func.func @transform_4(%arg0: i32) -> (i32, i32) {
    %c0_i32 = arith.constant 0 : i32
    %c0_i32_0 = arith.constant 0 : i32
    %c0_i32_1 = arith.constant 0 : i32
    return %c0_i32, %c0_i32_0 : i32, i32
  }
  func.func @transform_5(%arg0: i32) -> (i32, i32) {
    %c0_i32 = arith.constant 0 : i32
    %c0_i32_0 = arith.constant 0 : i32
    %c0_i32_1 = arith.constant 0 : i32
    return %c0_i32, %c0_i32_0 : i32, i32
  }
  func.func @transform_6(%arg0: i32) -> (i32, i32) {
    %c0_i32 = arith.constant 0 : i32
    %c0_i32_0 = arith.constant 0 : i32
    %c0_i32_1 = arith.constant 0 : i32
    return %c0_i32, %c0_i32_0 : i32, i32
  }
  func.func @transform_7(%arg0: i32) -> (i32, i32, i32) {
    %c0_i32 = arith.constant 0 : i32
    %c0_i32_0 = arith.constant 0 : i32
    %c0_i32_1 = arith.constant 0 : i32
    %c0_i32_2 = arith.constant 0 : i32
    return %c0_i32, %c0_i32_0, %c0_i32_1 : i32, i32, i32
  }
}

</mosaic_0001>

<bundles_post_ra>
// kernel: sgcm_forward.1
= control target key start
LH: loop header
LB: loop body
LE: loop exit
PB: predicated region body
PF: predicated region fallthrough
CT: control target
= control target key end

     0   :  { %vm59_vm0 = vcmask 261120   ;;  %vm343_vm1 = vcmask 64512   ;;  %vm4290_vm2 = vmmov 0   ;;  %vm614_vm3 = vcmask 130048   ;;  %s4292_s10 = smov 112   ;;  %s4293_s11 = smov 104   ;;  %s5400_s1 = inlined_call_operand.vmem [shape: bf16[256,32], index: 1, kind: input, shape index: {}]   ;;  %s5401_s0 = inlined_call_operand.vmem [shape: f32[64,32], index: 0, kind: input, shape index: {}]   ;;  %s5402_s6 = inlined_call_operand.vmem [shape: f32[48,32], index: 6, kind: input, shape index: {}]   ;;  %s5403_s5 = inlined_call_operand.vmem [shape: bf16[64,8], index: 5, kind: input, shape index: {}]   ;;  %s5404_s4 = inlined_call_operand.vmem [shape: bf16[16,16], index: 4, kind: input, shape index: {}]   ;;  %s5405_s3 = inlined_call_operand.vmem [shape: bf16[32,32], index: 3, kind: input, shape index: {}]   ;;  %s5406_s2 = inlined_call_operand.vmem [shape: bf16[32,128], index: 2, kind: input, shape index: {}]   ;;  %s5407_s7 = inlined_call_operand.vmem [shape: f32[2,32,32], index: 7, kind: output, shape index: {}]  }
   0x1   :  { %v4120_v0 = vld [vmem:[%s5400_s1 + $0x8] sm:$0xff]   ;;  %v4121_v1 = vld [vmem:[%s5400_s1] sm:$0xff]   ;;  %v29_v4 = vld [vmem:[%s5401_s0 + $0x10] sm:$0xff]  ;;  %s4294_s14 = smov 96   ;;  %s4296_s15 = smov 32   ;;  %vm2265_vm4 = vcmask 195584  }
   0x2   :  { %3721 = vmatprep.subr.bf16.mxu0 %v4120_v0  ;;  %v27_v2 = vld [vmem:[%s5401_s0] sm:$0xff]  ;;  %v28_v3 = vld [vmem:[%s5401_s0 + $0x8] sm:$0xff]  ;;  %v30_v6 = vld [vmem:[%s5401_s0 + $0x18] sm:$0xff]  ;;  %s4297_s16 = smov 8   ;;  %s4298_s17 = smov 16  }
   0x3   :  { %3722 = vmatpush3.bf16.msra.mxu0 %v4120_v0  ;;  %v31_v5 = vpack.c.bf16 %v28_v3, %v27_v2  ;;  %v4122_v7 = vld [vmem:[%s5400_s1 + $0x28] sm:$0xff]   ;;  %v32_v8 = vpack.c.bf16 %v30_v6, %v29_v4  ;;  %v4123_v9 = vld [vmem:[%s5400_s1 + $0x20] sm:$0xff]   ;;  %v4124_v10 = vld [vmem:[%s5400_s1 + $0x18] sm:$0xff]   ;;  %s4299_s18 = smov 24  }
   0x4   :  { %3723 = vmatprep.subr.bf16.mxu0 %v4121_v1  ;;  %3729 = vmatprep.subr.bf16.mxu1 %v4122_v7  ;;  %v33_v11 = vld [vmem:[%s5401_s0 + $0x20] sm:$0xff]  ;;  %v34_v12 = vld [vmem:[%s5401_s0 + $0x28] sm:$0xff]  ;;  %v35_v13 = vld [vmem:[%s5401_s0 + $0x30] sm:$0xff] }
   0x5   :  { %3725 = vmatprep.mubr.msk.bf16.mxu0 %vm59_vm0, %v31_v5  ;;  %3730 = vmatpush3.bf16.msra.mxu1 %v4122_v7  ;;  %v4378_v14 = vpack.c.bf16 %v34_v12, %v33_v11  ;;  %v36_v15 = vld [vmem:[%s5401_s0 + $0x38] sm:$0xff]  ;;  %v4125_v17 = vld [vmem:[%s5400_s1 + $0x10] sm:$0xff]   ;;  %v43_v21 = vld [vmem:[%s5402_s6] sm:$0xff] }
   0x6   :  { %3731 = vmatprep.subr.bf16.mxu1 %v4123_v9  ;;  %v4383_v16 = vpack.c.bf16 %v36_v15, %v35_v13  ;;  %v46_v20 = vld [vmem:[%s5402_s6 + $0x18] sm:$0xff]  ;;  %v44_v23 = vld [vmem:[%s5402_s6 + $0x8] sm:$0xff]  ;;  %v45_v24 = vld [vmem:[%s5402_s6 + $0x10] sm:$0xff] }
   0x7   :  { %3724 = vmatpush3.bf16.msra.mxu0 %v4121_v1  ;;  %3733 = vmatprep.mubr.msk.bf16.mxu1 %vm59_vm0, %v4378_v14  ;;  %v4126_v32 = vld [vmem:[%s5403_s5 + $0x8] sm:$0xff]   ;;  %v4127_v33 = vld [vmem:[%s5403_s5 + $0x18] sm:$0xff]   ;;  %v4128_v34 = vld [vmem:[%s5403_s5] sm:$0xff]  }
   0x8   :  { %3737 = vmatprep.subr.bf16.mxu0 %v4124_v10  ;;  %v4129_v35 = vld [vmem:[%s5403_s5 + $0x10] sm:$0xff]   ;;  %v3505_v47 = vld [vmem:[%s5402_s6 + $0x20] ss:$0 sm:$0xff] }
   0x9   :  { %3732 = vmatpush3.bf16.msra.mxu1 %v4123_v9 }
   0xa   :  { %3726 = vmatmul.mubr.msk.bf16.vlgmr.msra.gmra.mxu0 %vm59_vm0, %v32_v8  ;;  %3745 = vmatprep.subr.bf16.mxu1 %v4126_v32 }
   0xb   :  { %3738 = vmatpush3.bf16.msra.mxu0 %v4124_v10 }
   0xc   :  { %3734 = vmatmul.mubr.msk.bf16.vlgmr.msra.gmra.mxu1 %vm59_vm0, %v4383_v16  ;;  %3739 = vmatprep.subr.bf16.mxu0 %v4125_v17 }
   0xd   :  { %3746 = vmatpush3.bf16.msra.mxu1 %v4126_v32 }
   0xe   :  { %3747 = vmatprep.subr.bf16.mxu1 %v4128_v34 }
   0xf   :  { %3740 = vmatpush3.bf16.msra.mxu0 %v4125_v17 }
  0x10   :  { %3753 = vmatprep.subr.bf16.mxu0 %v4127_v33 }
  0x11   :  { %3748 = vmatpush3.bf16.msra.mxu1 %v4128_v34 }
  0xca   :  { %v3727_v18 = vpop.f32.mrf.mxu0 }
  0xcb   :  { %v109_v29 = vadd.f32 %v3727_v18, %v45_v24 }
  0xcc   :  { %v100_v19 = vpop.f32.mrf.mxu0  ;;  %v3735_v36 = vpop.f32.mrf.mxu1 }
  0xcd   :  { %v101_v27 = vadd.f32 %v100_v19, %v43_v21 }
  0xce   :  { %v3728_v22 = vpop.f32.mrf.mxu0  ;;  %v177_v37 = vpop.f32.mrf.mxu1 }
  0xcf   :  { %v112_v25 = vadd.f32 %v3728_v22, %v46_v20 }
  0xd0   :  { %v103_v26 = vpop.f32.mrf.mxu0  ;;  %v3736_v39 = vpop.f32.mrf.mxu1 }
  0xd1   :  { %v104_v28 = vadd.f32 %v103_v26, %v44_v23  ;;  %v4406_v31 = vpack.c.bf16 %v112_v25, %v109_v29  ;;  %v4289_v29 = vmov 0.0  }
  0xd2   :  { %v180_v44 = vpop.f32.mrf.mxu1  ;;  %3761 = vmatprep.subr.bf16.mxu1 %v4289_v29 }
  0xd3   :  { %v4404_v30 = vpack.c.bf16 %v104_v28, %v101_v27 }
  0xd5   :  { %3741 = vmatprep.mubr.msk.bf16.mxu0 %vm59_vm0, %v4404_v30 }
  0xd6   :  { %3742 = vmatmul.mubr.msk.bf16.vlgmr.msra.gmra.mxu0 %vm59_vm0, %v4406_v31 }
  0xd7   :  { %3754 = vmatpush3.bf16.msra.mxu0 %v4127_v33 }
  0xd8   :  { %3755 = vmatprep.subr.bf16.mxu0 %v4129_v35 }
  0xdb   :  { %3756 = vmatpush3.bf16.msra.mxu0 %v4129_v35 }
  0xdc   :  { %3767 = vmatprep.subr.bf16.mxu0 %v4289_v29 }
 0x196   :  { %v3743_v38 = vpop.f32.mrf.mxu0 }
 0x197   :  { %v253_v45 = vadd.f32 %v3743_v38, %v3735_v36 }
 0x198   :  { %v244_v40 = vpop.f32.mrf.mxu0 }
 0x199   :  { %v245_v42 = vadd.f32 %v244_v40, %v177_v37  ;;  %v4433_v52 = vadd.f32 %v3505_v47, %v253_v45 }
 0x19a   :  { %v3744_v41 = vpop.f32.mrf.mxu0 }
 0x19b   :  { %v256_v43 = vadd.f32 %v3744_v41, %v3736_v39  ;;  %v4429_v50 = vadd.f32 %v3505_v47, %v245_v42 }
 0x19c   :  { %v247_v46 = vpop.f32.mrf.mxu0 }
 0x19d   :  { %v248_v48 = vadd.f32 %v247_v46, %v180_v44  ;;  %v4427_v49 = vadd.f32 %v3505_v47, %v256_v43 }
 0x19f   :  { %v4431_v51 = vadd.f32 %v3505_v47, %v248_v48  ;;  %v269_v54 = vpack.c.bf16 %v4427_v49, %v4433_v52 }
 0x1a1   :  { %v268_v53 = vpack.c.bf16 %v4431_v51, %v4429_v50 }
 0x1a3   :  { %3749 = vmatprep.mubr.msk.bf16.mxu1 %vm59_vm0, %v268_v53  ;;  %3757 = vmatprep.mubr.msk.bf16.mxu0 %vm59_vm0, %v268_v53 }
 0x1a4   :  { %3750 = vmatmul.mubr.msk.bf16.vlgmr.msra.gmra.mxu1 %vm59_vm0, %v269_v54  ;;  %3758 = vmatmul.mubr.msk.bf16.vlgmr.msra.gmra.mxu0 %vm59_vm0, %v269_v54 }
 0x1a5   :  { %3763 = vmatprep.mubr.msk.bf16.mxu1 %vm4290_vm2, %v4289_v29  ;;  %3769 = vmatprep.mubr.msk.bf16.mxu0 %vm4290_vm2, %v4289_v29 }
 0x264   :  { %v4443_v55 = vpop.f32.mrf.mxu1  ;;  %v4445_v56 = vpop.f32.mrf.mxu0 }
 0x265   :  { %v486_v24 = vsel %vm343_vm1, %v4445_v56, 0.0  ;;  %v350_v26 = vsel %vm343_vm1, %v4443_v55, 0.0 }
 0x266   :  { %v326_v57 = vpop.f32.mrf.mxu1  ;;  %v463_v58 = vpop.f32.mrf.mxu0 }
 0x267   :  { %v480_v59 = vsel %vm343_vm1, %v463_v58, 0.0  ;;  %v344_v60 = vsel %vm343_vm1, %v326_v57, 0.0 }
 0x268   :  { %481 = vadd.xlane.f32.xlu0 %v480_v59  ;;  %v4449_v61 = vpop.f32.mrf.mxu0  ;;  %345 = vadd.xlane.f32.xlu1 %v344_v60  ;;  %v4451_v62 = vpop.f32.mrf.mxu1 }
 0x269   :  { %v489_v27 = vsel %vm343_vm1, %v4449_v61, 0.0  ;;  %v353_v28 = vsel %vm343_vm1, %v4451_v62, 0.0 }
 0x26a   :  { %v329_v63 = vpop.f32.mrf.mxu1  ;;  %v466_v0 = vpop.f32.mrf.mxu0 }
 0x26b   :  { %v483_v1 = vsel %vm343_vm1, %v466_v0, 0.0  ;;  %v347_v2 = vsel %vm343_vm1, %v329_v63, 0.0 }
 0x26c   :  { %484 = vadd.xlane.f32.xlu0 %v483_v1  ;;  %348 = vadd.xlane.f32.xlu1 %v347_v2 }
 0x2f1   :  { %v482_v3 = vpop.xlane.xlu0 %481  ;;  %v346_v4 = vpop.xlane.xlu1 %345 }
 0x2f2   :  { %v492_v5 = vmul.f32 0.125, %v482_v3  ;;  %v357_v6 = vmul.f32 0.125, %v346_v4 }
 0x2f4   :  { %v4455_v7 = vsub.f32 %v463_v58, %v492_v5  ;;  %v4457_v8 = vsub.f32 %v326_v57, %v357_v6  ;;  %v3516_v6 = vld [vmem:[%s5402_s6 + $0x2b] ss:$0 sm:$0xff] }
 0x2f5   :  { %v485_v9 = vpop.xlane.xlu0 %484  ;;  %v349_v10 = vpop.xlane.xlu1 %348 }
 0x2f6   :  { %v493_v11 = vmul.f32 0.125, %v485_v9  ;;  %v358_v12 = vmul.f32 0.125, %v349_v10  ;;  %v500_v13 = vmul.f32 %v4455_v7, %v4455_v7  ;;  %v365_v19 = vmul.f32 %v4457_v8, %v4457_v8 }
 0x2f8   :  { %v4461_v15 = vsub.f32 %v466_v0, %v493_v11  ;;  %v4463_v17 = vsub.f32 %v329_v63, %v358_v12  ;;  %v504_v18 = vsel %vm343_vm1, %v500_v13, 0.0  ;;  %v369_v21 = vsel %vm343_vm1, %v365_v19, 0.0  ;;  %v3517_v13 = vld [vmem:[%s5402_s6 + $0x2c] ss:$0 sm:$0xff] }
 0x2f9   :  { %505 = vadd.xlane.f32.xlu0 %v504_v18 }
 0x2fa   :  { %v501_v20 = vmul.f32 %v4461_v15, %v4461_v15  ;;  %v366_v23 = vmul.f32 %v4463_v17, %v4463_v17 }
 0x2fc   :  { %v507_v22 = vsel %vm343_vm1, %v501_v20, 0.0  ;;  %v372_v25 = vsel %vm343_vm1, %v366_v23, 0.0  ;;  %v3510_v23 = vld [vmem:[%s5402_s6 + $0x29] ss:$0 sm:$0xff] }
 0x2fd   :  { %370 = vadd.xlane.f32.xlu0 %v369_v21  ;;  %508 = vadd.xlane.f32.xlu1 %v507_v22 }
 0x301   :  { %487 = vadd.xlane.f32.xlu0 %v486_v24  ;;  %373 = vadd.xlane.f32.xlu1 %v372_v25 }
 0x305   :  { %351 = vadd.xlane.f32.xlu0 %v350_v26  ;;  %490 = vadd.xlane.f32.xlu1 %v489_v27  ;;  %v3511_v27 = vld [vmem:[%s5402_s6 + $0x2a] ss:$0 sm:$0xff] }
 0x309   :  { %354 = vadd.xlane.f32.xlu1 %v353_v28 }
 0x382   :  { %v506_v32 = vpop.xlane.xlu0 %505 }
 0x383   :  { %v516_v33 = vmul.f32 0.125, %v506_v32  ;;  %v4537_v32 = vld [vmem:[%s5404_s4] sm:$0xff]  }
 0x384   :  { %3768 = vmatpush3.bf16.msra.mxu0 %v4537_v32 }
 0x385   :  { %v520_v34 = vadd.f32 1e-05, %v516_v33  ;;  %v4131_v33 = vld [vmem:[%s5405_s3 + $0x8] sm:$0xff]   ;;  %3779 = vmatprep.subr.bf16.mxu0 %v4289_v29 }
 0x386   :  { %v371_v35 = vpop.xlane.xlu0 %370  ;;  %v509_v36 = vpop.xlane.xlu1 %508 }
 0x387   :  { %4145 = vrsqrt.f32 %v520_v34  ;;  %v381_v37 = vmul.f32 0.125, %v371_v35  ;;  %v517_v38 = vmul.f32 0.125, %v509_v36 }
 0x389   :  { %v521_v39 = vadd.f32 1e-05, %v517_v38  ;;  %v385_v40 = vadd.f32 1e-05, %v381_v37 }
 0x38a   :  { %v488_v41 = vpop.xlane.xlu0 %487  ;;  %v374_v42 = vpop.xlane.xlu1 %373 }
 0x38b   :  { %v494_v43 = vmul.f32 0.125, %v488_v41  ;;  %v382_v44 = vmul.f32 0.125, %v374_v42  ;;  %4147 = vrsqrt.f32 %v521_v39 }
 0x38c   :  { %4149 = vrsqrt.f32 %v385_v40 }
 0x38d   :  { %v4490_v45 = vsub.f32 %v4445_v56, %v494_v43  ;;  %v386_v46 = vadd.f32 1e-05, %v382_v44 }
 0x38e   :  { %v352_v47 = vpop.xlane.xlu0 %351  ;;  %v491_v48 = vpop.xlane.xlu1 %490 }
 0x38f   :  { %4151 = vrsqrt.f32 %v386_v46  ;;  %v359_v53 = vmul.f32 0.125, %v352_v47  ;;  %v495_v54 = vmul.f32 0.125, %v491_v48  ;;  %v502_v57 = vmul.f32 %v4490_v45, %v4490_v45 }
 0x391   :  { %v4495_v58 = vsub.f32 %v4443_v55, %v359_v53  ;;  %v4498_v59 = vsub.f32 %v4449_v61, %v495_v54  ;;  %v510_v60 = vsel %vm343_vm1, %v502_v57, 0.0 }
 0x392   :  { %511 = vadd.xlane.f32.xlu0 %v510_v60  ;;  %v355_v56 = vpop.xlane.xlu1 %354 }
 0x393   :  { %v360_v63 = vmul.f32 0.125, %v355_v56  ;;  %v367_v0 = vmul.f32 %v4495_v58, %v4495_v58  ;;  %v503_v1 = vmul.f32 %v4498_v59, %v4498_v59 }
 0x394   :  { %v4146_v2 = vpop.eup %4145 }
 0x395   :  { %v4506_v3 = vsub.f32 %v4451_v62, %v360_v63  ;;  %v375_v55 = vsel %vm343_vm1, %v367_v0, 0.0  ;;  %v513_v61 = vsel %vm343_vm1, %v503_v1, 0.0  ;;  %v528_v4 = vmul.f32 %v4146_v2, %v4455_v7 }
 0x396   :  { %376 = vadd.xlane.f32.xlu0 %v375_v55  ;;  %514 = vadd.xlane.f32.xlu1 %v513_v61 }
 0x397   :  { %v368_v5 = vmul.f32 %v4506_v3, %v4506_v3  ;;  %v536_v11 = vmul.f32 %v3516_v6, %v528_v4 }
 0x398   :  { %v4148_v9 = vpop.eup %4147 }
 0x399   :  { %v378_v10 = vsel %vm343_vm1, %v368_v5, 0.0  ;;  %v529_v62 = vmul.f32 %v4148_v9, %v4461_v15  ;;  %v4150_v12 = vpop.eup %4149  ;;  %v544_v21 = vadd.f32 %v3517_v13, %v536_v11 }
 0x39a   :  { %379 = vadd.xlane.f32.xlu1 %v378_v10  ;;  %v393_v20 = vmul.f32 %v4150_v12, %v4457_v8  ;;  %v4132_v12 = vld [vmem:[%s5405_s3] sm:$0xff]   ;;  %s4295_s3 = smov 64  }
 0x39b   :  { %v537_v18 = vmul.f32 %v3516_v6, %v529_v62 }
 0x39c   :  { %v4152_v7 = vpop.eup %4151  ;;  %v401_v26 = vmul.f32 %v3510_v23, %v393_v20  ;;  %v3522_v20 = vld [vmem:[%s5402_s6 + $0x28] ss:$0 sm:$0xff] }
 0x39d   :  { %v394_v19 = vmul.f32 %v4152_v7, %v4463_v17  ;;  %v545_v22 = vadd.f32 %v3517_v13, %v537_v18 }
 0x39e   :  { %v409_v8 = vadd.f32 %v3511_v27, %v401_v26 }
 0x39f   :  { %v559_v24 = vpack.c.bf16 %v545_v22, %v544_v21  ;;  %v402_v15 = vmul.f32 %v3510_v23, %v394_v19 }
 0x3a1   :  { %v564_v25 = vsel %vm343_vm1, %v559_v24, 0  ;;  %v410_v28 = vadd.f32 %v3511_v27, %v402_v15 }
 0x3a2   :  { %3762 = vmatpush3.bf16.xpose.msra.mxu1 %v564_v25 }
 0x3a3   :  { %3773 = vmatprep.subr.bf16.mxu1 %v4289_v29  ;;  %v558_v17 = vpack.c.bf16 %v410_v28, %v409_v8 }
 0x3a9   :  { %3764 = vmatmul.mubr.msk.bf16.vlgmr.msra.gmra.mxu1 %vm343_vm1, %v558_v17 }
 0x3aa   :  { %3775 = vmatprep.mubr.msk.bf16.mxu1 %vm4290_vm2, %v4289_v29  ;;  %3774 = vmatpush3.bf16.msra.mxu1 %v4131_v33 }
 0x3ab   :  { %3785 = vmatprep.subr.bf16.mxu1 %v4289_v29 }
 0x41b   :  { %v512_v35 = vpop.xlane.xlu0 %511 }
 0x41c   :  { %v518_v37 = vmul.f32 0.125, %v512_v35 }
 0x41e   :  { %v522_v39 = vadd.f32 1e-05, %v518_v37 }
 0x41f   :  { %v515_v34 = vpop.xlane.xlu1 %514  ;;  %v377_v41 = vpop.xlane.xlu0 %376 }
 0x420   :  { %v519_v36 = vmul.f32 0.125, %v515_v34  ;;  %v383_v43 = vmul.f32 0.125, %v377_v41  ;;  %v3527_v41 = vld [vmem:[%s5402_s6 + $0x25] ss:$0 sm:$0xff] }
 0x422   :  { %v523_v38 = vadd.f32 1e-05, %v519_v36  ;;  %v387_v46 = vadd.f32 1e-05, %v383_v43 }
 0x423   :  { %v380_v40 = vpop.xlane.xlu1 %379 }
 0x424   :  { %4153 = vrsqrt.f32 %v523_v38  ;;  %v384_v42 = vmul.f32 0.125, %v380_v40 }
 0x425   :  { %4155 = vrsqrt.f32 %v522_v39 }
 0x426   :  { %v388_v44 = vadd.f32 1e-05, %v384_v42 }
 0x428   :  { %4157 = vrsqrt.f32 %v388_v44 }
 0x429   :  { %4159 = vrsqrt.f32 %v387_v46 }
 0x431   :  { %v4154_v47 = vpop.eup %4153 }
 0x432   :  { %v4156_v48 = vpop.eup %4155  ;;  %v531_v53 = vmul.f32 %v4154_v47, %v4498_v59 }
 0x433   :  { %v530_v54 = vmul.f32 %v4156_v48, %v4490_v45  ;;  %v3528_v48 = vld [vmem:[%s5402_s6 + $0x26] ss:$0 sm:$0xff] }
 0x434   :  { %v539_v57 = vmul.f32 %v3516_v6, %v531_v53 }
 0x435   :  { %v538_v60 = vmul.f32 %v3516_v6, %v530_v54  ;;  %v4158_v56 = vpop.eup %4157 }
 0x436   :  { %v547_v63 = vadd.f32 %v3517_v13, %v539_v57  ;;  %v4160_v0 = vpop.eup %4159  ;;  %v396_v2 = vmul.f32 %v4158_v56, %v4506_v3 }
 0x437   :  { %v546_v55 = vadd.f32 %v3517_v13, %v538_v60  ;;  %v395_v4 = vmul.f32 %v4160_v0, %v4495_v58  ;;  %v3521_v13 = vld [vmem:[%s5402_s6 + $0x27] ss:$0 sm:$0xff] }
 0x438   :  { %v404_v62 = vmul.f32 %v3510_v23, %v396_v2 }
 0x439   :  { %v784_v5 = vpack.c.bf16 %v547_v63, %v546_v55  ;;  %v403_v6 = vmul.f32 %v3510_v23, %v395_v4 }
 0x43a   :  { %v412_v3 = vadd.f32 %v3511_v27, %v404_v62 }
 0x43b   :  { %v789_v45 = vsel %vm343_vm1, %v784_v5, 0  ;;  %v411_v58 = vadd.f32 %v3511_v27, %v403_v6  ;;  %v4133_v6 = vld [vmem:[%s5400_s1 + $0x38] sm:$0xff]  }
 0x43d   :  { %v783_v11 = vpack.c.bf16 %v412_v3, %v411_v58  ;;  %v4134_v3 = vld [vmem:[%s5400_s1 + $0x30] sm:$0xff]   ;;  %v4135_v58 = vld [vmem:[%s5400_s1 + $0x48] sm:$0xff]  }
 0x469   :  { %v600_v1 = vpop.f32.mrf.mxu1 }
 0x46b   :  { %v3765_v61 = vpop.f32.mrf.mxu1 }
 0x46d   :  { %v603_v9 = vpop.f32.mrf.mxu1 }
 0x46e   :  { %v607_v10 = vpack.c.bf16 %v603_v9, %v600_v1 }
 0x46f   :  { %v3766_v59 = vpop.f32.mrf.mxu1 }
 0x470   :  { %3770 = vmatmul.mubr.msk.bf16.vlgmr.msra.gmra.mxu0 %vm614_vm3, %v607_v10  ;;  %3776 = vmatmul.mubr.msk.bf16.vlgmr.msra.gmra.mxu1 %vm614_vm3, %v607_v10 }
 0x471   :  { %3786 = vmatpush3.bf16.xpose.msra.mxu1 %v789_v45  ;;  %3787 = vmatprep.mubr.msk.bf16.mxu1 %vm4290_vm2, %v4289_v29 }
 0x472   :  { %3797 = vmatprep.subr.bf16.mxu1 %v4289_v29  ;;  %3781 = vmatprep.mubr.msk.bf16.mxu0 %vm4290_vm2, %v4289_v29 }
 0x473   :  { %3780 = vmatpush3.bf16.msra.mxu0 %v4132_v12 }
 0x474   :  { %3791 = vmatprep.subr.bf16.mxu0 %v4289_v29 }
 0x478   :  { %3788 = vmatmul.mubr.msk.bf16.vlgmr.msra.gmra.mxu1 %vm343_vm1, %v783_v11 }
 0x479   :  { %3798 = vmatpush3.bf16.msra.mxu1 %v4131_v33  ;;  %3799 = vmatprep.mubr.msk.bf16.mxu1 %vm4290_vm2, %v4289_v29 }
 0x47a   :  { %3809 = vmatprep.subr.bf16.mxu1 %v4133_v6 }
 0x530   :  { %v652_v7 = vpop.f32.mrf.mxu0  ;;  %v714_v18 = vpop.f32.mrf.mxu1 }
 0x531   :  { %v663_v19 = vmul.f32 %v3521_v13, %v652_v7 }
 0x532   :  { %v3771_v21 = vpop.f32.mrf.mxu0  ;;  %v3777_v22 = vpop.f32.mrf.mxu1 }
 0x533   :  { %v669_v15 = vadd.f32 %v3522_v20, %v663_v19 }
 0x534   :  { %v655_v23 = vpop.f32.mrf.mxu0  ;;  %v717_v24 = vpop.f32.mrf.mxu1 }
 0x535   :  { %v664_v25 = vmul.f32 %v3521_v13, %v655_v23  ;;  %v671_v17 = vadd.f32 %v669_v15, %v600_v1  ;;  %v4136_v15 = vld [vmem:[%s5400_s1 + $0x40] sm:$0xff]  }
 0x536   :  { %v3772_v26 = vpop.f32.mrf.mxu0  ;;  %v3778_v27 = vpop.f32.mrf.mxu1 }
 0x537   :  { %v670_v28 = vadd.f32 %v3522_v20, %v664_v25  ;;  %v4137_v25 = vld [vmem:[%s5406_s2 + $0x8] sm:$0xff]  }
 0x538   :  { %v825_v8 = vpop.f32.mrf.mxu1 }
 0x539   :  { %v672_v33 = vadd.f32 %v670_v28, %v603_v9 }
 0x53a   :  { %v3789_v34 = vpop.f32.mrf.mxu1 }
 0x53b   :  { %v673_v35 = vpack.c.bf16 %v672_v33, %v671_v17  ;;  %v3541_v34 = vld [vmem:[%s5402_s6 + $0x21] ss:$0 sm:$0xff] }
 0x53c   :  { %v828_v36 = vpop.f32.mrf.mxu1 }
 0x53d   :  { %v832_v37 = vpack.c.bf16 %v828_v36, %v825_v8  ;;  %3782 = vmatmul.mubr.msk.bf16.vlgmr.msra.gmra.mxu0 %vm614_vm3, %v673_v35 }
 0x53e   :  { %v3790_v38 = vpop.f32.mrf.mxu1  ;;  %3792 = vmatpush3.bf16.msra.mxu0 %v4537_v32  ;;  %3793 = vmatprep.mubr.msk.bf16.mxu0 %vm4290_vm2, %v4289_v29 }
 0x53f   :  { %3800 = vmatmul.mubr.msk.bf16.vlgmr.msra.gmra.mxu1 %vm614_vm3, %v832_v37  ;;  %3803 = vmatprep.subr.bf16.mxu0 %v4289_v29 }
 0x540   :  { %3810 = vmatpush3.bf16.msra.mxu1 %v4133_v6 }
 0x541   :  { %3811 = vmatprep.subr.bf16.mxu1 %v4134_v3 }
 0x544   :  { %3812 = vmatpush3.bf16.msra.mxu1 %v4134_v3 }
 0x545   :  { %3794 = vmatmul.mubr.msk.bf16.vlgmr.msra.gmra.mxu0 %vm614_vm3, %v832_v37  ;;  %3825 = vmatprep.subr.bf16.mxu1 %v4135_v58 }
 0x546   :  { %3804 = vmatpush3.bf16.msra.mxu0 %v4132_v12  ;;  %3805 = vmatprep.mubr.msk.bf16.mxu0 %vm4290_vm2, %v4289_v29 }
 0x547   :  { %3817 = vmatprep.subr.bf16.mxu0 %v4137_v25 }
 0x5fd   :  { %v764_v39 = vpop.f32.mrf.mxu0 }
 0x5fe   :  { %v765_v40 = vadd.f32 %v764_v39, %v714_v18 }
 0x5ff   :  { %v3783_v32 = vpop.f32.mrf.mxu0  ;;  %v918_v42 = vpop.f32.mrf.mxu1 }
 0x600   :  { %v775_v46 = vmul.f32 %v3527_v41, %v765_v40 }
 0x601   :  { %v767_v43 = vpop.f32.mrf.mxu0  ;;  %v3801_v44 = vpop.f32.mrf.mxu1 }
 0x602   :  { %v768_v47 = vadd.f32 %v767_v43, %v717_v24  ;;  %v781_v63 = vadd.f32 %v3528_v48, %v775_v46 }
 0x603   :  { %v3784_v53 = vpop.f32.mrf.mxu0  ;;  %v921_v54 = vpop.f32.mrf.mxu1 }
 0x604   :  { %v776_v57 = vmul.f32 %v3527_v41, %v768_v47  ;;  %v4140_v53 = vld [vmem:[%s5400_s1 + $0x50] sm:$0xff]  }
 0x605   :  { %v870_v60 = vpop.f32.mrf.mxu0  ;;  %v3802_v56 = vpop.f32.mrf.mxu1 }
 0x606   :  { %v782_v0 = vadd.f32 %v3528_v48, %v776_v57  ;;  %v877_v1 = vmul.f32 %v3521_v13, %v870_v60 }
 0x607   :  { %v3795_v2 = vpop.f32.mrf.mxu0 }
 0x608   :  { %v973_v55 = vpack.c.bf16 %v782_v0, %v781_v63  ;;  %v879_v4 = vadd.f32 %v3522_v20, %v877_v1  ;;  %v4671_v1 = vld [vmem:[%s5402_s6 + $0x22] ss:$0 sm:$0xff] }
 0x609   :  { %v873_v61 = vpop.f32.mrf.mxu0 }
 0x60a   :  { %v878_v5 = vmul.f32 %v3521_v13, %v873_v61  ;;  %3813 = vmatprep.mubr.msk.bf16.mxu1 %vm59_vm0, %v973_v55  ;;  %v881_v62 = vadd.f32 %v879_v4, %v825_v8 }
 0x60b   :  { %v3796_v9 = vpop.f32.mrf.mxu0 }
 0x60c   :  { %v880_v10 = vadd.f32 %v3522_v20, %v878_v5 }
 0x60e   :  { %v882_v59 = vadd.f32 %v880_v10, %v828_v36 }
 0x610   :  { %v883_v45 = vpack.c.bf16 %v882_v59, %v881_v62 }
 0x612   :  { %3806 = vmatmul.mubr.msk.bf16.vlgmr.msra.gmra.mxu0 %vm614_vm3, %v883_v45 }
 0x613   :  { %3818 = vmatpush3.bf16.msra.mxu0 %v4137_v25 }
 0x6d2   :  { %v962_v11 = vpop.f32.mrf.mxu0 }
 0x6d3   :  { %v963_v12 = vadd.f32 %v962_v11, %v918_v42 }
 0x6d4   :  { %v3807_v13 = vpop.f32.mrf.mxu0 }
 0x6d5   :  { %v969_v18 = vmul.f32 %v3527_v41, %v963_v12 }
 0x6d6   :  { %v965_v7 = vpop.f32.mrf.mxu0 }
 0x6d7   :  { %v966_v19 = vadd.f32 %v965_v7, %v921_v54  ;;  %v971_v22 = vadd.f32 %v3528_v48, %v969_v18 }
 0x6d8   :  { %v3808_v20 = vpop.f32.mrf.mxu0 }
 0x6d9   :  { %v970_v21 = vmul.f32 %v3527_v41, %v966_v19 }
 0x6db   :  { %v972_v23 = vadd.f32 %v3528_v48, %v970_v21  ;;  %v4139_v48 = vld [vmem:[%s5400_s1 + $0x58] sm:$0xff]  }
 0x6dd   :  { %v974_v24 = vpack.c.bf16 %v972_v23, %v971_v22 }
 0x6df   :  { %3814 = vmatmul.mubr.msk.bf16.vlgmr.msra.gmra.mxu1 %vm59_vm0, %v974_v24 }
 0x6e0   :  { %3826 = vmatpush3.bf16.msra.mxu1 %v4135_v58  ;;  %3829 = vmatprep.mubr.msk.bf16.mxu1 %vm59_vm0, %v4404_v30  ;;  %v4138_v30 = vld [vmem:[%s5406_s2] sm:$0xff]   ;;  %s4291_s2 = smov 120  }
 0x6e1   :  { %3827 = vmatprep.subr.bf16.mxu1 %v4136_v15  ;;  %3819 = vmatprep.subr.bf16.mxu0 %v4138_v30 }
 0x6e2   :  { %3820 = vmatpush3.bf16.msra.mxu0 %v4138_v30 }
 0x6e3   :  { %3833 = vmatprep.subr.bf16.mxu0 %v4139_v48 }
 0x6e4   :  { %3828 = vmatpush3.bf16.msra.mxu1 %v4136_v15 }
 0x6e5   :  { %3841 = vmatprep.subr.bf16.mxu1 %v4289_v29 }
 0x6e7   :  { %3830 = vmatmul.mubr.msk.bf16.vlgmr.msra.gmra.mxu1 %vm59_vm0, %v4406_v31 }
 0x6e8   :  { %3843 = vmatprep.mubr.msk.bf16.mxu1 %vm4290_vm2, %v4289_v29 }
 0x79f   :  { %v3815_v26 = vpop.f32.mrf.mxu1 }
 0x7a0   :  { %v1048_v17 = vadd.f32 %v3815_v26, %v4433_v52 }
 0x7a1   :  { %v1031_v27 = vpop.f32.mrf.mxu1 }
 0x7a2   :  { %v1046_v31 = vadd.f32 %v1031_v27, %v4429_v50  ;;  %v1052_v41 = vmax.f32 %v1048_v17, 0.0 }
 0x7a3   :  { %v3816_v28 = vpop.f32.mrf.mxu1 }
 0x7a4   :  { %v1049_v8 = vadd.f32 %v3816_v28, %v4427_v49  ;;  %v1050_v38 = vmax.f32 %v1046_v31, 0.0 }
 0x7a5   :  { %v1034_v33 = vpop.f32.mrf.mxu1 }
 0x7a6   :  { %v1047_v35 = vadd.f32 %v1034_v33, %v4431_v51  ;;  %v1053_v36 = vmax.f32 %v1049_v8, 0.0 }
 0x7a7   :  { %v3831_v37 = vpop.f32.mrf.mxu1 }
 0x7a8   :  { %v1051_v39 = vmax.f32 %v1047_v35, 0.0  ;;  %v1193_v40 = vadd.f32 %v3831_v37, %v3541_v34  ;;  %v1055_v50 = vpack.c.bf16 %v1053_v36, %v1052_v41 }
 0x7a9   :  { %v1184_v32 = vpop.f32.mrf.mxu1 }
 0x7aa   :  { %v1054_v42 = vpack.c.bf16 %v1051_v39, %v1050_v38  ;;  %v1185_v44 = vadd.f32 %v3541_v34, %v1184_v32 }
 0x7ab   :  { %v3832_v43 = vpop.f32.mrf.mxu1 }
 0x7ac   :  { %v1196_v49 = vadd.f32 %v3832_v43, %v3541_v34  ;;  %3821 = vmatprep.mubr.msk.bf16.mxu0 %vm59_vm0, %v1054_v42 }
 0x7ad   :  { %3822 = vmatmul.mubr.msk.bf16.vlgmr.msra.gmra.mxu0 %vm59_vm0, %v1055_v50  ;;  %v1187_v52 = vpop.f32.mrf.mxu1 }
 0x7ae   :  { %v4622_v46 = vpack.c.bf16 %v1196_v49, %v1193_v40  ;;  %v1188_v51 = vadd.f32 %v3541_v34, %v1187_v52  ;;  %3837 = vmatprep.mubr.msk.bf16.mxu0 %vm59_vm0, %v4378_v14  ;;  %3834 = vmatpush3.bf16.msra.mxu0 %v4139_v48 }
 0x7af   :  { %3835 = vmatprep.subr.bf16.mxu0 %v4140_v53 }
 0x7b0   :  { %v1199_v47 = vpack.c.bf16 %v1188_v51, %v1185_v44 }
 0x7b2   :  { %1274 = vrot.lane.b32.xlu1 %v1199_v47, %s4291_s2  ;;  %3836 = vmatpush3.bf16.msra.mxu0 %v4140_v53 }
 0x7b3   :  { %3847 = vmatprep.subr.bf16.mxu0 %v4289_v29 }
 0x7b5   :  { %3838 = vmatmul.mubr.msk.bf16.vlgmr.msra.gmra.mxu0 %vm59_vm0, %v4383_v16 }
 0x7b6   :  { %3849 = vmatprep.mubr.msk.bf16.mxu0 %vm4290_vm2, %v4289_v29 }
 0x824   :  { %v1275_v9 = vpop.permute.xlu1 %1274 }
 0x86d   :  { %v3823_v14 = vpop.f32.mrf.mxu0 }
 0x86f   :  { %v1112_v54 = vpop.f32.mrf.mxu0 }
 0x871   :  { %v3824_v57 = vpop.f32.mrf.mxu0 }
 0x872   :  { %v4650_v16 = vpack.c.bf16 %v3824_v57, %v3823_v14 }
 0x873   :  { %v1115_v60 = vpop.f32.mrf.mxu0 }
 0x874   :  { %v4638_v56 = vpack.c.bf16 %v1115_v60, %v1112_v54  ;;  %v1493_v12 = vsel %vm343_vm1, %v4650_v16, 0 }
 0x875   :  { %v3839_v0 = vpop.f32.mrf.mxu0 }
 0x876   :  { %1290 = vrot.lane.b32.xlu1 %v4638_v56, %s4292_s10  ;;  %1288 = vrot.lane.b32.xlu0 %v4638_v56, %s4291_s2  ;;  %v1305_v63 = vsel %vm343_vm1, %v4638_v56, 0  ;;  %v1265_v55 = vadd.f32 %v3839_v0, %v4671_v1 }
 0x877   :  { %3842 = vmatpush3.bf16.xpose.msra.mxu1 %v1305_v63  ;;  %v4673_v2 = vpop.f32.mrf.mxu0 }
 0x878   :  { %3853 = vmatprep.subr.bf16.mxu1 %v4289_v29 }
 0x879   :  { %v3840_v61 = vpop.f32.mrf.mxu0 }
 0x87a   :  { %1292 = vrot.lane.b32.xlu1 %v4638_v56, %s4293_s11  ;;  %1276 = vrot.lane.b32.xlu0 %v1199_v47, %s4292_s10  ;;  %v1268_v4 = vadd.f32 %v3840_v61, %v4671_v1 }
 0x87b   :  { %v4742_v31 = vpop.f32.mrf.mxu0 }
 0x87c   :  { %v4677_v5 = vpack.c.bf16 %v1268_v4, %v1265_v55 }
 0x87e   :  { %1278 = vrot.lane.b32.xlu1 %v1199_v47, %s4293_s11  ;;  %1295 = vrot.lane.b32.xlu0 %v4650_v16, %s4291_s2 }
 0x87f   :  { %3844 = vmatmul.mubr.msk.bf16.vlgmr.msra.gmra.mxu1 %vm343_vm1, %v1199_v47 }
 0x880   :  { %3855 = vmatprep.mubr.msk.bf16.mxu1 %vm4290_vm2, %v4289_v29 }
 0x882   :  { %1297 = vrot.lane.b32.xlu1 %v4650_v16, %s4292_s10  ;;  %1281 = vrot.lane.b32.xlu0 %v4622_v46, %s4291_s2 }
 0x886   :  { %1299 = vrot.lane.b32.xlu1 %v4650_v16, %s4293_s11  ;;  %1283 = vrot.lane.b32.xlu0 %v4622_v46, %s4292_s10 }
 0x88a   :  { %1285 = vrot.lane.b32.xlu1 %v4622_v46, %s4293_s11 }
 0x8e8   :  { %v4679_v10 = vpop.permute.xlu1 %1290  ;;  %v4681_v62 = vpop.permute.xlu0 %1288 }
 0x8e9   :  { %v1352_v59 = vsel %vm343_vm1, %v4681_v62, 0  ;;  %v1399_v45 = vsel %vm343_vm1, %v4679_v10, 0 }
 0x8ea   :  { %3848 = vmatpush3.bf16.xpose.msra.mxu0 %v1352_v59  ;;  %3854 = vmatpush3.bf16.xpose.msra.mxu1 %v1399_v45 }
 0x8eb   :  { %3859 = vmatprep.subr.bf16.mxu0 %v4289_v29  ;;  %3865 = vmatprep.subr.bf16.mxu1 %v4289_v29 }
 0x8ec   :  { %v4689_v6 = vpop.permute.xlu1 %1292  ;;  %v1277_v3 = vpop.permute.xlu0 %1276 }
 0x8ed   :  { %v1446_v11 = vsel %vm343_vm1, %v4689_v6, 0 }
 0x8f0   :  { %v1279_v58 = vpop.permute.xlu1 %1278  ;;  %v4701_v13 = vpop.permute.xlu0 %1295 }
 0x8f1   :  { %3850 = vmatmul.mubr.msk.bf16.vlgmr.msra.gmra.mxu0 %vm343_vm1, %v1275_v9  ;;  %3856 = vmatmul.mubr.msk.bf16.vlgmr.msra.gmra.mxu1 %vm343_vm1, %v1277_v3  ;;  %v1540_v18 = vsel %vm343_vm1, %v4701_v13, 0 }
 0x8f2   :  { %3860 = vmatpush3.bf16.xpose.msra.mxu0 %v1446_v11  ;;  %3866 = vmatpush3.bf16.xpose.msra.mxu1 %v1493_v12 }
 0x8f3   :  { %3861 = vmatprep.mubr.msk.bf16.mxu0 %vm4290_vm2, %v4289_v29  ;;  %3867 = vmatprep.mubr.msk.bf16.mxu1 %vm4290_vm2, %v4289_v29 }
 0x8f4   :  { %3871 = vmatprep.subr.bf16.mxu0 %v4289_v29  ;;  %3877 = vmatprep.subr.bf16.mxu1 %v4289_v29  ;;  %v4705_v7 = vpop.permute.xlu1 %1297  ;;  %v1282_v20 = vpop.permute.xlu0 %1281 }
 0x8f5   :  { %v1587_v19 = vsel %vm343_vm1, %v4705_v7, 0 }
 0x8f8   :  { %v4720_v21 = vpop.permute.xlu1 %1299  ;;  %v1284_v22 = vpop.permute.xlu0 %1283 }
 0x8f9   :  { %3862 = vmatmul.mubr.msk.bf16.vlgmr.msra.gmra.mxu0 %vm343_vm1, %v1279_v58  ;;  %3868 = vmatmul.mubr.msk.bf16.vlgmr.msra.gmra.mxu1 %vm343_vm1, %v4622_v46  ;;  %v1634_v23 = vsel %vm343_vm1, %v4720_v21, 0 }
 0x8fa   :  { %3872 = vmatpush3.bf16.xpose.msra.mxu0 %v1540_v18  ;;  %3878 = vmatpush3.bf16.xpose.msra.mxu1 %v1587_v19 }
 0x8fb   :  { %3873 = vmatprep.mubr.msk.bf16.mxu0 %vm4290_vm2, %v4289_v29  ;;  %3879 = vmatprep.mubr.msk.bf16.mxu1 %vm4290_vm2, %v4289_v29 }
 0x8fc   :  { %3883 = vmatprep.subr.bf16.mxu0 %v4289_v29  ;;  %3889 = vmatprep.subr.bf16.mxu1 %v4289_v29  ;;  %v1286_v24 = vpop.permute.xlu1 %1285 }
 0x901   :  { %3874 = vmatmul.mubr.msk.bf16.vlgmr.msra.gmra.mxu0 %vm343_vm1, %v1282_v20  ;;  %3880 = vmatmul.mubr.msk.bf16.vlgmr.msra.gmra.mxu1 %vm343_vm1, %v1284_v22 }
 0x902   :  { %3884 = vmatpush3.bf16.xpose.msra.mxu0 %v1634_v23  ;;  %3885 = vmatprep.mubr.msk.bf16.mxu0 %vm4290_vm2, %v4289_v29 }
 0x903   :  { %3895 = vmatprep.subr.bf16.mxu0 %v4289_v29  ;;  %3891 = vmatprep.mubr.msk.bf16.mxu1 %vm4290_vm2, %v4289_v29 }
 0x909   :  { %3886 = vmatmul.mubr.msk.bf16.vlgmr.msra.gmra.mxu0 %vm343_vm1, %v1286_v24 }
 0x90a   :  { %3897 = vmatprep.mubr.msk.bf16.mxu0 %vm4290_vm2, %v4289_v29 }
 0x93f   :  { %v4734_v15 = vpop.f32.mrf.mxu1 }
 0x940   :  { %v1677_v25 = vsel %vm614_vm3, %v4734_v15, -inf }
 0x941   :  { %1678 = vmax.xlane.f32.xlu0 %v1677_v25  ;;  %v3845_v30 = vpop.f32.mrf.mxu1 }
 0x943   :  { %v4738_v26 = vpop.f32.mrf.mxu1 }
 0x944   :  { %v1680_v27 = vsel %vm614_vm3, %v4738_v26, -inf }
 0x945   :  { %1681 = vmax.xlane.f32.xlu1 %v1680_v27  ;;  %v3846_v28 = vpop.f32.mrf.mxu1 }
 0x9b1   :  { %v4744_v8 = vpop.f32.mrf.mxu0  ;;  %v4746_v17 = vpop.f32.mrf.mxu1 }
 0x9b2   :  { %v1683_v33 = vsel %vm614_vm3, %v4744_v8, -inf  ;;  %v1689_v50 = vsel %vm614_vm3, %v4746_v17, -inf }
 0x9b3   :  { %v3851_v34 = vpop.f32.mrf.mxu0  ;;  %1684 = vmax.xlane.f32.xlu0 %v1683_v33  ;;  %v3857_v35 = vpop.f32.mrf.mxu1 }
 0x9b5   :  { %v4750_v36 = vpop.f32.mrf.mxu0  ;;  %v4752_v37 = vpop.f32.mrf.mxu1 }
 0x9b6   :  { %v1686_v38 = vsel %vm614_vm3, %v4750_v36, -inf  ;;  %v1692_v39 = vsel %vm614_vm3, %v4752_v37, -inf }
 0x9b7   :  { %v3852_v40 = vpop.f32.mrf.mxu0  ;;  %1687 = vmax.xlane.f32.xlu0 %v1686_v38  ;;  %1693 = vmax.xlane.f32.xlu1 %v1692_v39  ;;  %v3858_v41 = vpop.f32.mrf.mxu1 }
 0x9b9   :  { %v4758_v32 = vpop.f32.mrf.mxu0  ;;  %v4760_v42 = vpop.f32.mrf.mxu1 }
 0x9ba   :  { %v1695_v46 = vsel %vm614_vm3, %v4758_v32, -inf  ;;  %v1701_v54 = vsel %vm614_vm3, %v4760_v42, -inf }
 0x9bb   :  { %v3863_v43 = vpop.f32.mrf.mxu0  ;;  %1690 = vmax.xlane.f32.xlu0 %v1689_v50  ;;  %v3869_v49 = vpop.f32.mrf.mxu1 }
 0x9bd   :  { %v4764_v52 = vpop.f32.mrf.mxu0  ;;  %v4766_v44 = vpop.f32.mrf.mxu1 }
 0x9be   :  { %v1698_v51 = vsel %vm614_vm3, %v4764_v52, -inf  ;;  %v1704_v57 = vsel %vm614_vm3, %v4766_v44, -inf }
 0x9bf   :  { %v3864_v47 = vpop.f32.mrf.mxu0  ;;  %1696 = vmax.xlane.f32.xlu0 %v1695_v46  ;;  %1699 = vmax.xlane.f32.xlu1 %v1698_v51  ;;  %v3870_v48 = vpop.f32.mrf.mxu1 }
 0x9c1   :  { %v4772_v53 = vpop.f32.mrf.mxu0  ;;  %v4774_v14 = vpop.f32.mrf.mxu1 }
 0x9c2   :  { %v1707_v61 = vsel %vm614_vm3, %v4772_v53, -inf  ;;  %v1713_v3 = vsel %vm614_vm3, %v4774_v14, -inf }
 0x9c3   :  { %v3875_v60 = vpop.f32.mrf.mxu0  ;;  %1702 = vmax.xlane.f32.xlu0 %v1701_v54  ;;  %1705 = vmax.xlane.f32.xlu1 %v1704_v57  ;;  %v3881_v63 = vpop.f32.mrf.mxu1 }
 0x9c5   :  { %v4780_v0 = vpop.f32.mrf.mxu0  ;;  %v4782_v55 = vpop.f32.mrf.mxu1 }
 0x9c6   :  { %v1710_v4 = vsel %vm614_vm3, %v4780_v0, -inf  ;;  %v1716_v58 = vsel %vm614_vm3, %v4782_v55, -inf }
 0x9c7   :  { %v3876_v9 = vpop.f32.mrf.mxu0  ;;  %1708 = vmax.xlane.f32.xlu0 %v1707_v61  ;;  %1711 = vmax.xlane.f32.xlu1 %v1710_v4  ;;  %v3882_v59 = vpop.f32.mrf.mxu1 }
 0x9c9   :  { %v4788_v45 = vpop.f32.mrf.mxu0 }
 0x9ca   :  { %v1719_v18 = vsel %vm614_vm3, %v4788_v45, -inf  ;;  %v1679_v20 = vpop.xlane.xlu0 %1678 }
 0x9cb   :  { %v3887_v11 = vpop.f32.mrf.mxu0  ;;  %1714 = vmax.xlane.f32.xlu0 %v1713_v3  ;;  %1717 = vmax.xlane.f32.xlu1 %v1716_v58  ;;  %v1725_v22 = vsub.f32 %v4734_v15, %v1679_v20 }
 0x9cd   :  { %v4794_v12 = vpop.f32.mrf.mxu0  ;;  %v1741_v23 = vmul.f32 1.442695, %v1725_v22 }
 0x9ce   :  { %v1722_v24 = vsel %vm614_vm3, %v4794_v12, -inf  ;;  %v1682_v27 = vpop.xlane.xlu1 %1681 }
 0x9cf   :  { %v3888_v19 = vpop.f32.mrf.mxu0  ;;  %1720 = vmax.xlane.f32.xlu0 %v1719_v18  ;;  %4161 = vpow2.f32 %v1741_v23  ;;  %v1726_v28 = vsub.f32 %v4738_v26, %v1682_v27 }
 0x9d1   :  { %v1743_v15 = vmul.f32 1.442695, %v1726_v28 }
 0x9d3   :  { %4163 = vpow2.f32 %v1743_v15 }
 0x9dc   :  { %1908 = vrot.lane.b32.xlu1 %v4681_v62, %s4294_s14  ;;  %v4807_v25 = vpop.eup %4161 }
 0x9dd   :  { %v1773_v30 = vsel %vm614_vm3, %v4807_v25, 0.0 }
 0x9e0   :  { %1955 = vrot.lane.b32.xlu1 %v4679_v10, %s4294_s14  ;;  %v4814_v34 = vpop.eup %4163 }
 0x9e1   :  { %v1776_v41 = vsel %vm614_vm3, %v4814_v34, 0.0 }
 0x9e4   :  { %2002 = vrot.lane.b32.xlu1 %v4689_v6, %s4294_s14 }
 0x9e5   :  { %1861 = vrot.lane.b32.xlu0 %v4638_v56, %s4294_s14 }
 0x9e9   :  { %2049 = vrot.lane.b32.xlu0 %v4650_v16, %s4294_s14 }
 0x9ed   :  { %2143 = vrot.lane.b32.xlu0 %v4705_v7, %s4294_s14 }
 0xa08   :  { %1723 = vmax.xlane.f32.xlu1 %v1722_v24 }
 0xa0c   :  { %1774 = vadd.xlane.f32.xlu0 %v1773_v30 }
 0xa19   :  { %2096 = vrot.lane.b32.xlu1 %v4701_v13, %s4294_s14 }
 0xa1d   :  { %2190 = vrot.lane.b32.xlu1 %v4720_v21, %s4294_s14 }
 0xa3c   :  { %v1685_v33 = vpop.xlane.xlu0 %1684 }
 0xa3d   :  { %v1727_v35 = vsub.f32 %v4744_v8, %v1685_v33 }
 0xa3f   :  { %v1745_v38 = vmul.f32 1.442695, %v1727_v35 }
 0xa40   :  { %v1688_v39 = vpop.xlane.xlu0 %1687  ;;  %v1694_v40 = vpop.xlane.xlu1 %1693 }
 0xa41   :  { %4165 = vpow2.f32 %v1745_v38  ;;  %v1728_v50 = vsub.f32 %v4750_v36, %v1688_v39  ;;  %v1730_v43 = vsub.f32 %v4752_v37, %v1694_v40  ;;  %1777 = vadd.xlane.f32.xlu1 %v1776_v41 }
 0xa43   :  { %v1747_v26 = vmul.f32 1.442695, %v1728_v50  ;;  %v1751_v49 = vmul.f32 1.442695, %v1730_v43 }
 0xa44   :  { %v1691_v46 = vpop.xlane.xlu0 %1690 }
 0xa45   :  { %4167 = vpow2.f32 %v1747_v26  ;;  %v1729_v51 = vsub.f32 %v4746_v17, %v1691_v46 }
 0xa46   :  { %4169 = vpow2.f32 %v1751_v49 }
 0xa47   :  { %v1749_v8 = vmul.f32 1.442695, %v1729_v51 }
 0xa48   :  { %v1697_v47 = vpop.xlane.xlu0 %1696  ;;  %v1700_v48 = vpop.xlane.xlu1 %1699 }
 0xa49   :  { %4171 = vpow2.f32 %v1749_v8  ;;  %v1731_v54 = vsub.f32 %v4758_v32, %v1697_v47  ;;  %v1732_v57 = vsub.f32 %v4764_v52, %v1700_v48 }
 0xa4b   :  { %v1753_v60 = vmul.f32 1.442695, %v1731_v54  ;;  %v1755_v36 = vmul.f32 1.442695, %v1732_v57 }
 0xa4c   :  { %v1703_v63 = vpop.xlane.xlu0 %1702  ;;  %v1706_v37 = vpop.xlane.xlu1 %1705 }
 0xa4d   :  { %4173 = vpow2.f32 %v1753_v60  ;;  %v1733_v61 = vsub.f32 %v4760_v42, %v1703_v63  ;;  %v1734_v4 = vsub.f32 %v4766_v44, %v1706_v37 }
 0xa4e   :  { %v4826_v9 = vpop.eup %4165  ;;  %4175 = vpow2.f32 %v1755_v36 }
 0xa4f   :  { %v1757_v17 = vmul.f32 1.442695, %v1733_v61  ;;  %v1759_v59 = vmul.f32 1.442695, %v1734_v4  ;;  %v1779_v3 = vsel %vm614_vm3, %v4826_v9, 0.0 }
 0xa50   :  { %v1709_v32 = vpop.xlane.xlu0 %1708  ;;  %v1712_v58 = vpop.xlane.xlu1 %1711  ;;  %1780 = vadd.xlane.f32.xlu0 %v1779_v3 }
 0xa51   :  { %4177 = vpow2.f32 %v1757_v17  ;;  %v1735_v52 = vsub.f32 %v4772_v53, %v1709_v32  ;;  %v1736_v11 = vsub.f32 %v4780_v0, %v1712_v58  ;;  %v1260_v58 = vadd.f32 %v4671_v1, %v4742_v31 }
 0xa52   :  { %v4832_v18 = vpop.eup %4167  ;;  %4179 = vpow2.f32 %v1759_v59 }
 0xa53   :  { %v1761_v42 = vmul.f32 1.442695, %v1735_v52  ;;  %v1763_v44 = vmul.f32 1.442695, %v1736_v11  ;;  %v1782_v19 = vsel %vm614_vm3, %v4832_v18, 0.0  ;;  %v4836_v20 = vpop.eup %4169 }
 0xa54   :  { %v1715_v22 = vpop.xlane.xlu0 %1714  ;;  %1783 = vadd.xlane.f32.xlu1 %v1782_v19  ;;  %v1718_v23 = vpop.xlane.xlu1 %1717  ;;  %v1788_v15 = vsel %vm614_vm3, %v4836_v20, 0.0 }
 0xa55   :  { %4181 = vpow2.f32 %v1761_v42  ;;  %v1737_v24 = vsub.f32 %v4774_v14, %v1715_v22  ;;  %v1738_v53 = vsub.f32 %v4782_v55, %v1718_v23 }
 0xa56   :  { %v4840_v30 = vpop.eup %4171  ;;  %4183 = vpow2.f32 %v1763_v44 }
 0xa57   :  { %v1765_v0 = vmul.f32 1.442695, %v1737_v24  ;;  %v1767_v27 = vmul.f32 1.442695, %v1738_v53  ;;  %v1785_v28 = vsel %vm614_vm3, %v4840_v30, 0.0 }
 0xa58   :  { %1786 = vadd.xlane.f32.xlu0 %v1785_v28  ;;  %v1721_v33 = vpop.xlane.xlu0 %1720  ;;  %1789 = vadd.xlane.f32.xlu1 %v1788_v15  ;;  %v1909_v35 = vpop.permute.xlu1 %1908 }
 0xa59   :  { %4185 = vpow2.f32 %v1765_v0  ;;  %v1739_v14 = vsub.f32 %v4788_v45, %v1721_v33  ;;  %3896 = vmatpush3.bf16.msra.mxu0 %v1909_v35 }
 0xa5a   :  { %v4847_v55 = vpop.eup %4173  ;;  %4187 = vpow2.f32 %v1767_v27  ;;  %3907 = vmatprep.subr.bf16.mxu0 %v4289_v29 }
 0xa5b   :  { %v4850_v38 = vpop.eup %4175  ;;  %v1769_v39 = vmul.f32 1.442695, %v1739_v14  ;;  %v1791_v40 = vsel %vm614_vm3, %v4847_v55, 0.0 }
 0xa5c   :  { %1792 = vadd.xlane.f32.xlu0 %v1791_v40  ;;  %v1862_v41 = vpop.permute.xlu0 %1861  ;;  %v1794_v50 = vsel %vm614_vm3, %v4850_v38, 0.0  ;;  %v1956_v37 = vpop.permute.xlu1 %1955 }
 0xa5d   :  { %4189 = vpow2.f32 %v1769_v39  ;;  %1795 = vadd.xlane.f32.xlu1 %v1794_v50  ;;  %3890 = vmatpush3.bf16.msra.mxu1 %v1862_v41 }
 0xa5e   :  { %v4856_v45 = vpop.eup %4177  ;;  %3901 = vmatprep.subr.bf16.mxu1 %v4289_v29 }
 0xa5f   :  { %v4859_v43 = vpop.eup %4179  ;;  %v1797_v26 = vsel %vm614_vm3, %v4856_v45, 0.0 }
 0xa60   :  { %1798 = vadd.xlane.f32.xlu0 %v1797_v26  ;;  %v1800_v49 = vsel %vm614_vm3, %v4859_v43, 0.0  ;;  %v4891_v61 = vpop.permute.xlu1 %2002  ;;  %v4916_v11 = vpop.permute.xlu0 %2049 }
 0xa61   :  { %1801 = vadd.xlane.f32.xlu1 %v1800_v49 }
 0xa62   :  { %v4865_v46 = vpop.eup %4181 }
 0xa63   :  { %v4867_v51 = vpop.eup %4183  ;;  %v1803_v8 = vsel %vm614_vm3, %v4865_v46, 0.0 }
 0xa64   :  { %1804 = vadd.xlane.f32.xlu0 %v1803_v8  ;;  %v1806_v47 = vsel %vm614_vm3, %v4867_v51, 0.0  ;;  %v4922_v44 = vpop.permute.xlu0 %2143 }
 0xa65   :  { %1807 = vadd.xlane.f32.xlu1 %v1806_v47 }
 0xa66   :  { %v4873_v48 = vpop.eup %4185 }
 0xa67   :  { %v4875_v54 = vpop.eup %4187  ;;  %v1809_v57 = vsel %vm614_vm3, %v4873_v48, 0.0 }
 0xa68   :  { %1810 = vadd.xlane.f32.xlu0 %v1809_v57  ;;  %v1812_v60 = vsel %vm614_vm3, %v4875_v54, 0.0 }
 0xa69   :  { %1813 = vadd.xlane.f32.xlu1 %v1812_v60 }
 0xa6a   :  { %v4881_v36 = vpop.eup %4189 }
 0xa6b   :  { %v1815_v63 = vsel %vm614_vm3, %v4881_v36, 0.0 }
 0xa6c   :  { %1816 = vadd.xlane.f32.xlu0 %v1815_v63 }
 0xa82   :  { %2312 = vrot.lane.b32.xlu0 %v4638_v56, %s4295_s3 }
 0xa86   :  { %2410 = vrot.lane.b32.xlu0 %v4679_v10, %s4295_s3 }
 0xa8a   :  { %2459 = vrot.lane.b32.xlu0 %v4689_v6, %s4295_s3 }
 0xa8e   :  { %2508 = vrot.lane.b32.xlu0 %v4650_v16, %s4295_s3 }
 0xa91   :  { %v1724_v4 = vpop.xlane.xlu1 %1723 }
 0xa92   :  { %v1740_v17 = vsub.f32 %v4794_v12, %v1724_v4  ;;  %2557 = vrot.lane.b32.xlu0 %v4701_v13, %s4295_s3  ;;  %v1257_v12 = vadd.f32 %v4671_v1, %v4673_v2 }
 0xa94   :  { %v1771_v59 = vmul.f32 1.442695, %v1740_v17  ;;  %v4912_v52 = vpack.c.bf16 %v1260_v58, %v1257_v12 }
 0xa95   :  { %v4920_v42 = vpop.permute.xlu1 %2096  ;;  %v1775_v1 = vpop.xlane.xlu0 %1774 }
 0xa96   :  { %4191 = vpow2.f32 %v1771_v59  ;;  %2306 = vrot.lane.b32.xlu0 %v4677_v5, %s4291_s2 }
 0xa97   :  { %4193 = vrcp.f32 %v1775_v1 }
 0xa99   :  { %v4926_v2 = vpop.permute.xlu1 %2190 }
 0xa9a   :  { %2308 = vrot.lane.b32.xlu0 %v4677_v5, %s4292_s10 }
 0xaa3   :  { %v4902_v3 = vpop.eup %4191 }
 0xaa4   :  { %v1818_v32 = vsel %vm614_vm3, %v4902_v3, 0.0  ;;  %v4194_v19 = vpop.eup %4193 }
 0xaa5   :  { %1819 = vadd.xlane.f32.xlu1 %v1818_v32  ;;  %v1837_v24 = vmul.f32 %v4194_v19, %v4807_v25 }
 0xab6   :  { %2361 = vrot.lane.b32.xlu1 %v4681_v62, %s4295_s3 }
 0xaba   :  { %2299 = vrot.lane.b32.xlu1 %v4912_v52, %s4291_s2 }
 0xabe   :  { %2301 = vrot.lane.b32.xlu1 %v4912_v52, %s4292_s10 }
 0xac2   :  { %2303 = vrot.lane.b32.xlu1 %v4912_v52, %s4293_s11 }
 0xac6   :  { %2606 = vrot.lane.b32.xlu1 %v4705_v7, %s4295_s3 }
 0xaca   :  { %2655 = vrot.lane.b32.xlu1 %v4720_v21, %s4295_s3  ;;  %v1778_v31 = vpop.xlane.xlu1 %1777 }
 0xacb   :  { %4195 = vrcp.f32 %v1778_v31 }
 0xace   :  { %2310 = vrot.lane.b32.xlu1 %v4677_v5, %s4293_s11 }
 0xad8   :  { %v4196_v22 = vpop.eup %4195 }
 0xad9   :  { %v1781_v23 = vpop.xlane.xlu0 %1780  ;;  %v1838_v53 = vmul.f32 %v4196_v22, %v4814_v34 }
 0xada   :  { %4197 = vrcp.f32 %v1781_v23 }
 0xadb   :  { %v1853_v0 = vpack.c.bf16 %v1838_v53, %v1837_v24 }
 0xadd   :  { %3892 = vmatmul.mubr.msk.bf16.vlgmr.msra.gmra.mxu1 %vm614_vm3, %v1853_v0  ;;  %v1784_v27 = vpop.xlane.xlu1 %1783 }
 0xade   :  { %3902 = vmatpush3.bf16.msra.mxu1 %v1956_v37  ;;  %4199 = vrcp.f32 %v1784_v27  ;;  %3903 = vmatprep.mubr.msk.bf16.mxu1 %vm4290_vm2, %v4289_v29 }
 0xadf   :  { %3913 = vmatprep.subr.bf16.mxu1 %v4289_v29 }
 0xae1   :  { %v1787_v28 = vpop.xlane.xlu0 %1786  ;;  %v1790_v15 = vpop.xlane.xlu1 %1789 }
 0xae2   :  { %4201 = vrcp.f32 %v1787_v28 }
 0xae3   :  { %4203 = vrcp.f32 %v1790_v15 }
 0xae5   :  { %v1793_v33 = vpop.xlane.xlu0 %1792 }
 0xae6   :  { %4205 = vrcp.f32 %v1793_v33  ;;  %v1796_v25 = vpop.xlane.xlu1 %1795 }
 0xae7   :  { %4207 = vrcp.f32 %v1796_v25  ;;  %v4198_v34 = vpop.eup %4197 }
 0xae8   :  { %v1839_v40 = vmul.f32 %v4198_v34, %v4826_v9 }
 0xae9   :  { %v1799_v35 = vpop.xlane.xlu0 %1798 }
 0xaea   :  { %4209 = vrcp.f32 %v1799_v35  ;;  %v1802_v14 = vpop.xlane.xlu1 %1801 }
 0xaeb   :  { %v4200_v39 = vpop.eup %4199  ;;  %4211 = vrcp.f32 %v1802_v14 }
 0xaec   :  { %v1840_v41 = vmul.f32 %v4200_v39, %v4832_v18 }
 0xaed   :  { %v1805_v50 = vpop.xlane.xlu0 %1804 }
 0xaee   :  { %4213 = vrcp.f32 %v1805_v50  ;;  %v1808_v26 = vpop.xlane.xlu1 %1807  ;;  %v1854_v49 = vpack.c.bf16 %v1840_v41, %v1839_v40 }
 0xaef   :  { %v4202_v8 = vpop.eup %4201  ;;  %4215 = vrcp.f32 %v1808_v26 }
 0xaf0   :  { %v4204_v47 = vpop.eup %4203  ;;  %3898 = vmatmul.mubr.msk.bf16.vlgmr.msra.gmra.mxu0 %vm614_vm3, %v1854_v49  ;;  %v1841_v57 = vmul.f32 %v4202_v8, %v4840_v30 }
 0xaf1   :  { %3908 = vmatpush3.bf16.msra.mxu0 %v4891_v61  ;;  %v1811_v60 = vpop.xlane.xlu0 %1810  ;;  %v1842_v63 = vmul.f32 %v4204_v47, %v4836_v20  ;;  %3909 = vmatprep.mubr.msk.bf16.mxu0 %vm4290_vm2, %v4289_v29 }
 0xaf2   :  { %4217 = vrcp.f32 %v1811_v60  ;;  %v1814_v9 = vpop.xlane.xlu1 %1813  ;;  %3919 = vmatprep.subr.bf16.mxu0 %v4289_v29 }
 0xaf3   :  { %v4206_v18 = vpop.eup %4205  ;;  %4219 = vrcp.f32 %v1814_v9  ;;  %v1855_v37 = vpack.c.bf16 %v1842_v63, %v1841_v57 }
 0xaf4   :  { %v4208_v4 = vpop.eup %4207  ;;  %v1843_v17 = vmul.f32 %v4206_v18, %v4847_v55 }
 0xaf5   :  { %3904 = vmatmul.mubr.msk.bf16.vlgmr.msra.gmra.mxu1 %vm614_vm3, %v1855_v37  ;;  %v1844_v30 = vmul.f32 %v4208_v4, %v4850_v38 }
 0xaf6   :  { %3914 = vmatpush3.bf16.msra.mxu1 %v4916_v11  ;;  %3915 = vmatprep.mubr.msk.bf16.mxu1 %vm4290_vm2, %v4289_v29  ;;  %v1817_v11 = vpop.xlane.xlu0 %1816 }
 0xaf7   :  { %v4210_v20 = vpop.eup %4209  ;;  %v1856_v61 = vpack.c.bf16 %v1844_v30, %v1843_v17  ;;  %3925 = vmatprep.subr.bf16.mxu1 %v4289_v29  ;;  %4221 = vrcp.f32 %v1817_v11 }
 0xaf8   :  { %v4212_v59 = vpop.eup %4211  ;;  %v1845_v32 = vmul.f32 %v4210_v20, %v4856_v45 }
 0xaf9   :  { %3910 = vmatmul.mubr.msk.bf16.vlgmr.msra.gmra.mxu0 %vm614_vm3, %v1856_v61  ;;  %v1846_v55 = vmul.f32 %v4212_v59, %v4859_v43 }
 0xafa   :  { %3920 = vmatpush3.bf16.msra.mxu0 %v4920_v42  ;;  %3921 = vmatprep.mubr.msk.bf16.mxu0 %vm4290_vm2, %v4289_v29  ;;  %v2313_v22 = vpop.permute.xlu0 %2312 }
 0xafb   :  { %v4214_v38 = vpop.eup %4213  ;;  %v1857_v12 = vpack.c.bf16 %v1846_v55, %v1845_v32  ;;  %3931 = vmatprep.subr.bf16.mxu0 %v4289_v29 }
 0xafc   :  { %v4216_v58 = vpop.eup %4215  ;;  %v1847_v1 = vmul.f32 %v4214_v38, %v4865_v46 }
 0xafd   :  { %3916 = vmatmul.mubr.msk.bf16.vlgmr.msra.gmra.mxu1 %vm614_vm3, %v1857_v12  ;;  %v1848_v45 = vmul.f32 %v4216_v58, %v4867_v51 }
 0xafe   :  { %3926 = vmatpush3.bf16.msra.mxu1 %v4922_v44  ;;  %3927 = vmatprep.mubr.msk.bf16.mxu1 %vm4290_vm2, %v4289_v29  ;;  %v2318_v44 = vsel %vm343_vm1, %v2313_v22, 0 }
 0xaff   :  { %v4218_v43 = vpop.eup %4217  ;;  %v1858_v42 = vpack.c.bf16 %v1848_v45, %v1847_v1  ;;  %3937 = vmatprep.subr.bf16.mxu1 %v4289_v29 }
 0xb00   :  { %v4220_v31 = vpop.eup %4219  ;;  %v1849_v19 = vmul.f32 %v4218_v43, %v4873_v48  ;;  %v2411_v48 = vpop.permute.xlu0 %2410 }
 0xb01   :  { %3922 = vmatmul.mubr.msk.bf16.vlgmr.msra.gmra.mxu0 %vm614_vm3, %v1858_v42  ;;  %v1850_v46 = vmul.f32 %v4220_v31, %v4875_v54  ;;  %v2416_v54 = vsel %vm343_vm1, %v2411_v48, 0 }
 0xb02   :  { %3932 = vmatpush3.bf16.msra.mxu0 %v4926_v2  ;;  %3933 = vmatprep.mubr.msk.bf16.mxu0 %vm4290_vm2, %v4289_v29 }
 0xb03   :  { %v1859_v51 = vpack.c.bf16 %v1850_v46, %v1849_v19  ;;  %3943 = vmatprep.subr.bf16.mxu0 %v4289_v29 }
 0xb04   :  { %v2460_v23 = vpop.permute.xlu0 %2459  ;;  %v4222_v27 = vpop.eup %4221 }
 0xb05   :  { %3928 = vmatmul.mubr.msk.bf16.vlgmr.msra.gmra.mxu1 %vm614_vm3, %v1859_v51  ;;  %v1851_v33 = vmul.f32 %v4222_v27, %v4881_v36 }
 0xb06   :  { %3938 = vmatpush3.bf16.xpose.msra.mxu1 %v2318_v44  ;;  %3939 = vmatprep.mubr.msk.bf16.mxu1 %vm4290_vm2, %v4289_v29 }
 0xb07   :  { %3949 = vmatprep.subr.bf16.mxu1 %v4289_v29 }
 0xb08   :  { %v2509_v0 = vpop.permute.xlu0 %2508 }
 0xb09   :  { %v2514_v15 = vsel %vm343_vm1, %v2509_v0, 0 }
 0xb0c   :  { %v2558_v34 = vpop.permute.xlu0 %2557 }
 0xb0d   :  { %3940 = vmatmul.mubr.msk.bf16.vlgmr.msra.gmra.mxu1 %vm343_vm1, %v4912_v52 }
 0xb0e   :  { %3950 = vmatpush3.bf16.xpose.msra.mxu1 %v2416_v54  ;;  %3951 = vmatprep.mubr.msk.bf16.mxu1 %vm4290_vm2, %v4289_v29 }
 0xb0f   :  { %3961 = vmatprep.subr.bf16.mxu1 %v4289_v29 }
 0xb10   :  { %v2307_v36 = vpop.permute.xlu0 %2306 }
 0xb14   :  { %v2309_v50 = vpop.permute.xlu0 %2308 }
 0xb2e   :  { %v1820_v2 = vpop.xlane.xlu1 %1819 }
 0xb2f   :  { %4223 = vrcp.f32 %v1820_v2 }
 0xb32   :  { %v2362_v24 = vpop.permute.xlu1 %2361 }
 0xb33   :  { %v2367_v39 = vsel %vm343_vm1, %v2362_v24, 0 }
 0xb36   :  { %v2300_v53 = vpop.permute.xlu1 %2299 }
 0xb3a   :  { %v2302_v28 = vpop.permute.xlu1 %2301 }
 0xb3b   :  { %3952 = vmatmul.mubr.msk.bf16.vlgmr.msra.gmra.mxu1 %vm343_vm1, %v2302_v28 }
 0xb3c   :  { %v4224_v52 = vpop.eup %4223  ;;  %3962 = vmatpush3.bf16.xpose.msra.mxu1 %v2514_v15  ;;  %3963 = vmatprep.mubr.msk.bf16.mxu1 %vm4290_vm2, %v4289_v29 }
 0xb3d   :  { %v1852_v25 = vmul.f32 %v4224_v52, %v4902_v3  ;;  %3973 = vmatprep.subr.bf16.mxu1 %v4289_v29  ;;  %v2465_v3 = vsel %vm343_vm1, %v2460_v23, 0 }
 0xb3e   :  { %v2304_v35 = vpop.permute.xlu1 %2303 }
 0xb3f   :  { %v1860_v14 = vpack.c.bf16 %v1852_v25, %v1851_v33 }
 0xb41   :  { %3934 = vmatmul.mubr.msk.bf16.vlgmr.msra.gmra.mxu0 %vm614_vm3, %v1860_v14 }
 0xb42   :  { %3944 = vmatpush3.bf16.xpose.msra.mxu0 %v2367_v39  ;;  %v2607_v40 = vpop.permute.xlu1 %2606  ;;  %3945 = vmatprep.mubr.msk.bf16.mxu0 %vm4290_vm2, %v4289_v29 }
 0xb43   :  { %v2612_v41 = vsel %vm343_vm1, %v2607_v40, 0  ;;  %3964 = vmatmul.mubr.msk.bf16.vlgmr.msra.gmra.mxu1 %vm343_vm1, %v4677_v5  ;;  %3955 = vmatprep.subr.bf16.mxu0 %v4289_v29  ;;  %v2563_v5 = vsel %vm343_vm1, %v2558_v34, 0 }
 0xb44   :  { %3974 = vmatpush3.bf16.xpose.msra.mxu1 %v2612_v41  ;;  %3975 = vmatprep.mubr.msk.bf16.mxu1 %vm4290_vm2, %v4289_v29 }
 0xb45   :  { %3985 = vmatprep.subr.bf16.mxu1 %v4289_v29 }
 0xb46   :  { %v2656_v26 = vpop.permute.xlu1 %2655 }
 0xb47   :  { %v2661_v49 = vsel %vm343_vm1, %v2656_v26, 0 }
 0xb49   :  { %3946 = vmatmul.mubr.msk.bf16.vlgmr.msra.gmra.mxu0 %vm343_vm1, %v2300_v53 }
 0xb4a   :  { %3956 = vmatpush3.bf16.xpose.msra.mxu0 %v2465_v3  ;;  %3957 = vmatprep.mubr.msk.bf16.mxu0 %vm4290_vm2, %v4289_v29  ;;  %v2311_v8 = vpop.permute.xlu1 %2310 }
 0xb4b   :  { %3976 = vmatmul.mubr.msk.bf16.vlgmr.msra.gmra.mxu1 %vm343_vm1, %v2309_v50  ;;  %3967 = vmatprep.subr.bf16.mxu0 %v4289_v29 }
 0xb4c   :  { %3987 = vmatprep.mubr.msk.bf16.mxu1 %vm4290_vm2, %v4289_v29 }
 0xb51   :  { %3958 = vmatmul.mubr.msk.bf16.vlgmr.msra.gmra.mxu0 %vm343_vm1, %v2304_v35 }
 0xb52   :  { %3968 = vmatpush3.bf16.xpose.msra.mxu0 %v2563_v5  ;;  %3969 = vmatprep.mubr.msk.bf16.mxu0 %vm4290_vm2, %v4289_v29 }
 0xb53   :  { %3979 = vmatprep.subr.bf16.mxu0 %v4289_v29 }
 0xb59   :  { %3970 = vmatmul.mubr.msk.bf16.vlgmr.msra.gmra.mxu0 %vm343_vm1, %v2307_v36 }
 0xb5a   :  { %3980 = vmatpush3.bf16.xpose.msra.mxu0 %v2661_v49  ;;  %3981 = vmatprep.mubr.msk.bf16.mxu0 %vm4290_vm2, %v4289_v29 }
 0xb5b   :  { %3991 = vmatprep.subr.bf16.mxu0 %v4289_v29 }
 0xb61   :  { %3982 = vmatmul.mubr.msk.bf16.vlgmr.msra.gmra.mxu0 %vm343_vm1, %v2311_v8 }
 0xb62   :  { %3993 = vmatprep.mubr.msk.bf16.mxu0 %vm4290_vm2, %v4289_v29 }
 0xb9d   :  { %v5027_v47 = vpop.f32.mrf.mxu1 }
 0xb9f   :  { %v3893_v57 = vpop.f32.mrf.mxu1 }
 0xba1   :  { %v5029_v60 = vpop.f32.mrf.mxu1 }
 0xba3   :  { %v3894_v63 = vpop.f32.mrf.mxu1 }
 0xbb0   :  { %v5031_v9 = vpop.f32.mrf.mxu0 }
 0xbb2   :  { %v3899_v18 = vpop.f32.mrf.mxu0 }
 0xbb4   :  { %v5033_v37 = vpop.f32.mrf.mxu0 }
 0xbb5   :  { %v4060_v4 = vpack.i.bf16 %v5033_v37, %v5031_v9  ;;  %v5037_v17 = vpop.f32.mrf.mxu1 }
 0xbb6   :  { %v3900_v30 = vpop.f32.mrf.mxu0 }
 0xbb7   :  { %v3905_v20 = vpop.f32.mrf.mxu1 }
 0xbb9   :  { %v5039_v61 = vpop.f32.mrf.mxu1  ;;  %v5041_v59 = vpop.f32.mrf.mxu0 }
 0xbba   :  { %v4065_v32 = vpack.i.bf16 %v5039_v61, %v5037_v17 }
 0xbbb   :  { %v3906_v55 = vpop.f32.mrf.mxu1  ;;  %v3911_v38 = vpop.f32.mrf.mxu0 }
 0xbbd   :  { %v5045_v12 = vpop.f32.mrf.mxu0  ;;  %v5047_v58 = vpop.f32.mrf.mxu1 }
 0xbbe   :  { %v4075_v11 = vpack.i.bf16 %v5045_v12, %v5041_v59 }
 0xbbf   :  { %v3912_v1 = vpop.f32.mrf.mxu0  ;;  %v3917_v45 = vpop.f32.mrf.mxu1 }
 0xbc1   :  { %v5051_v43 = vpop.f32.mrf.mxu1  ;;  %v5053_v42 = vpop.f32.mrf.mxu0 }
 0xbc3   :  { %v3918_v31 = vpop.f32.mrf.mxu1  ;;  %v3923_v19 = vpop.f32.mrf.mxu0 }
 0xbc5   :  { %v5055_v46 = vpop.f32.mrf.mxu0  ;;  %v5057_v22 = vpop.f32.mrf.mxu1 }
 0xbc6   :  { %v4070_v51 = vpack.i.bf16 %v5055_v46, %v5053_v42 }
 0xbc7   :  { %v3924_v44 = vpop.f32.mrf.mxu0  ;;  %v3929_v48 = vpop.f32.mrf.mxu1 }
 0xbc9   :  { %v5061_v54 = vpop.f32.mrf.mxu1 }
 0xbca   :  { %v4080_v2 = vpack.i.bf16 %v5061_v54, %v5057_v22 }
 0xbcb   :  { %v3930_v23 = vpop.f32.mrf.mxu1 }
 0xbcd   :  { %v5065_v24 = vpop.f32.mrf.mxu1 }
 0xbce   :  { %v2704_v53 = vsel %vm614_vm3, %v5065_v24, -inf }
 0xbcf   :  { %2705 = vmax.xlane.f32.xlu0 %v2704_v53  ;;  %v3941_v0 = vpop.f32.mrf.mxu1 }
 0xbd1   :  { %v5069_v27 = vpop.f32.mrf.mxu1 }
 0xbd2   :  { %v2707_v28 = vsel %vm614_vm3, %v5069_v27, -inf }
 0xbd3   :  { %2708 = vmax.xlane.f32.xlu1 %v2707_v28  ;;  %v3942_v15 = vpop.f32.mrf.mxu1 }
 0xbfb   :  { %v5073_v52 = vpop.f32.mrf.mxu1 }
 0xbfc   :  { %v2716_v31 = vsel %vm614_vm3, %v5073_v52, -inf }
 0xbfd   :  { %v3953_v33 = vpop.f32.mrf.mxu1 }
 0xbff   :  { %v5075_v25 = vpop.f32.mrf.mxu1 }
 0xc00   :  { %v2719_v34 = vsel %vm614_vm3, %v5075_v25, -inf }
 0xc01   :  { %v5079_v35 = vpop.f32.mrf.mxu0  ;;  %2720 = vmax.xlane.f32.xlu1 %v2719_v34  ;;  %v3954_v14 = vpop.f32.mrf.mxu1 }
 0xc03   :  { %v3935_v39 = vpop.f32.mrf.mxu0  ;;  %v5081_v40 = vpop.f32.mrf.mxu1 }
 0xc04   :  { %v2728_v28 = vsel %vm614_vm3, %v5081_v40, -inf }
 0xc05   :  { %v5083_v41 = vpop.f32.mrf.mxu0  ;;  %v3965_v36 = vpop.f32.mrf.mxu1 }
 0xc06   :  { %v4110_v3 = vpack.i.bf16 %v5083_v41, %v5079_v35 }
 0xc07   :  { %v3936_v50 = vpop.f32.mrf.mxu0  ;;  %v5087_v5 = vpop.f32.mrf.mxu1 }
 0xc08   :  { %v2731_v15 = vsel %vm614_vm3, %v5087_v5, -inf }
 0xc09   :  { %v5089_v26 = vpop.f32.mrf.mxu0  ;;  %v3966_v49 = vpop.f32.mrf.mxu1 }
 0xc0a   :  { %v2710_v8 = vsel %vm614_vm3, %v5089_v26, -inf }
 0xc0b   :  { %v3947_v57 = vpop.f32.mrf.mxu0  ;;  %2711 = vmax.xlane.f32.xlu0 %v2710_v8  ;;  %v5093_v63 = vpop.f32.mrf.mxu1 }
 0xc0c   :  { %v2740_v49 = vsel %vm614_vm3, %v5093_v63, -inf }
 0xc0d   :  { %v5095_v18 = vpop.f32.mrf.mxu0  ;;  %v3977_v30 = vpop.f32.mrf.mxu1 }
 0xc0e   :  { %v2713_v20 = vsel %vm614_vm3, %v5095_v18, -inf }
 0xc0f   :  { %v3948_v55 = vpop.f32.mrf.mxu0  ;;  %2714 = vmax.xlane.f32.xlu0 %v2713_v20  ;;  %v5099_v38 = vpop.f32.mrf.mxu1 }
 0xc10   :  { %v2743_v8 = vsel %vm614_vm3, %v5099_v38, -inf }
 0xc11   :  { %v5101_v1 = vpop.f32.mrf.mxu0  ;;  %v3978_v45 = vpop.f32.mrf.mxu1 }
 0xc12   :  { %v2722_v48 = vsel %vm614_vm3, %v5101_v1, -inf }
 0xc13   :  { %v3959_v19 = vpop.f32.mrf.mxu0  ;;  %2717 = vmax.xlane.f32.xlu0 %v2716_v31 }
 0xc15   :  { %v5105_v44 = vpop.f32.mrf.mxu0 }
 0xc16   :  { %v2725_v23 = vsel %vm614_vm3, %v5105_v44, -inf }
 0xc17   :  { %v3960_v53 = vpop.f32.mrf.mxu0  ;;  %2723 = vmax.xlane.f32.xlu0 %v2722_v48  ;;  %2726 = vmax.xlane.f32.xlu1 %v2725_v23 }
 0xc19   :  { %v5111_v0 = vpop.f32.mrf.mxu0 }
 0xc1a   :  { %v2734_v14 = vsel %vm614_vm3, %v5111_v0, -inf }
 0xc1b   :  { %v3971_v33 = vpop.f32.mrf.mxu0  ;;  %2729 = vmax.xlane.f32.xlu0 %v2728_v28  ;;  %2732 = vmax.xlane.f32.xlu1 %v2731_v15 }
 0xc1d   :  { %v5117_v34 = vpop.f32.mrf.mxu0 }
 0xc1e   :  { %v2737_v39 = vsel %vm614_vm3, %v5117_v34, -inf }
 0xc1f   :  { %v3972_v36 = vpop.f32.mrf.mxu0  ;;  %2735 = vmax.xlane.f32.xlu0 %v2734_v14  ;;  %2738 = vmax.xlane.f32.xlu1 %v2737_v39 }
 0xc21   :  { %v5123_v50 = vpop.f32.mrf.mxu0 }
 0xc22   :  { %v2746_v20 = vsel %vm614_vm3, %v5123_v50, -inf }
 0xc23   :  { %v3983_v57 = vpop.f32.mrf.mxu0  ;;  %2741 = vmax.xlane.f32.xlu0 %v2740_v49  ;;  %2744 = vmax.xlane.f32.xlu1 %v2743_v8 }
 0xc25   :  { %v5129_v30 = vpop.f32.mrf.mxu0 }
 0xc27   :  { %v3984_v55 = vpop.f32.mrf.mxu0  ;;  %2747 = vmax.xlane.f32.xlu0 %v2746_v20 }
 0xc34   :  { %2935 = vrot.lane.b32.xlu1 %v4681_v62, %s4296_s15  ;;  %v2749_v62 = vsel %vm614_vm3, %v5129_v30, -inf }
 0xc38   :  { %2982 = vrot.lane.b32.xlu1 %v4679_v10, %s4296_s15 }
 0xc3c   :  { %3029 = vrot.lane.b32.xlu1 %v4689_v6, %s4296_s15 }
 0xc3d   :  { %2888 = vrot.lane.b32.xlu0 %v4638_v56, %s4296_s15 }
 0xc41   :  { %3076 = vrot.lane.b32.xlu0 %v4650_v16, %s4296_s15 }
 0xc58   :  { %v2706_v45 = vpop.xlane.xlu0 %2705 }
 0xc59   :  { %v2752_v31 = vsub.f32 %v5065_v24, %v2706_v45 }
 0xc5b   :  { %v2768_v19 = vmul.f32 1.442695, %v2752_v31 }
 0xc5c   :  { %v2709_v56 = vpop.xlane.xlu1 %2708 }
 0xc5d   :  { %4225 = vpow2.f32 %v2768_v19  ;;  %v2753_v16 = vsub.f32 %v5069_v27, %v2709_v56 }
 0xc5f   :  { %v2770_v6 = vmul.f32 1.442695, %v2753_v16 }
 0xc60   :  { %2750 = vmax.xlane.f32.xlu1 %v2749_v62 }
 0xc61   :  { %4227 = vpow2.f32 %v2770_v6 }
 0xc6a   :  { %v5146_v48 = vpop.eup %4225 }
 0xc6b   :  { %v2800_v10 = vsel %vm614_vm3, %v5146_v48, 0.0 }
 0xc6c   :  { %2801 = vadd.xlane.f32.xlu0 %v2800_v10 }
 0xc6e   :  { %v5153_v24 = vpop.eup %4227 }
 0xc6f   :  { %v2803_v28 = vsel %vm614_vm3, %v5153_v24, 0.0 }
 0xc71   :  { %3123 = vrot.lane.b32.xlu1 %v4701_v13, %s4296_s15 }
 0xc8a   :  { %v2721_v23 = vpop.xlane.xlu1 %2720 }
 0xc8b   :  { %v2757_v33 = vsub.f32 %v5075_v25, %v2721_v23 }
 0xc8d   :  { %v2778_v27 = vmul.f32 1.442695, %v2757_v33 }
 0xc94   :  { %v2712_v53 = vpop.xlane.xlu0 %2711 }
 0xc95   :  { %v2754_v15 = vsub.f32 %v5089_v26, %v2712_v53  ;;  %2804 = vadd.xlane.f32.xlu1 %v2803_v28 }
 0xc97   :  { %v2772_v14 = vmul.f32 1.442695, %v2754_v15 }
 0xc98   :  { %v2715_v39 = vpop.xlane.xlu0 %2714 }
 0xc99   :  { %4229 = vpow2.f32 %v2772_v14  ;;  %v2755_v13 = vsub.f32 %v5095_v18, %v2715_v39 }
 0xc9b   :  { %v2774_v36 = vmul.f32 1.442695, %v2755_v13 }
 0xc9c   :  { %v2718_v49 = vpop.xlane.xlu0 %2717 }
 0xc9d   :  { %4231 = vpow2.f32 %v2774_v36  ;;  %v2756_v8 = vsub.f32 %v5073_v52, %v2718_v49 }
 0xc9e   :  { %4233 = vpow2.f32 %v2778_v27 }
 0xc9f   :  { %v2776_v57 = vmul.f32 1.442695, %v2756_v8 }
 0xca0   :  { %v2724_v20 = vpop.xlane.xlu0 %2723  ;;  %v2727_v55 = vpop.xlane.xlu1 %2726 }
 0xca1   :  { %4235 = vpow2.f32 %v2776_v57  ;;  %v2758_v26 = vsub.f32 %v5101_v1, %v2724_v20  ;;  %v2759_v25 = vsub.f32 %v5105_v44, %v2727_v55 }
 0xca3   :  { %v2780_v45 = vmul.f32 1.442695, %v2758_v26  ;;  %v2782_v31 = vmul.f32 1.442695, %v2759_v25 }
 0xca4   :  { %v2730_v19 = vpop.xlane.xlu0 %2729  ;;  %v2733_v62 = vpop.xlane.xlu1 %2732 }
 0xca5   :  { %4237 = vpow2.f32 %v2780_v45  ;;  %v2760_v18 = vsub.f32 %v5081_v40, %v2730_v19  ;;  %v2761_v10 = vsub.f32 %v5087_v5, %v2733_v62 }
 0xca6   :  { %v5165_v56 = vpop.eup %4229  ;;  %4239 = vpow2.f32 %v2782_v31 }
 0xca7   :  { %v2784_v52 = vmul.f32 1.442695, %v2760_v18  ;;  %v2786_v16 = vmul.f32 1.442695, %v2761_v10  ;;  %v2806_v6 = vsel %vm614_vm3, %v5165_v56, 0.0 }
 0xca8   :  { %v2736_v1 = vpop.xlane.xlu0 %2735  ;;  %v2739_v23 = vpop.xlane.xlu1 %2738  ;;  %2807 = vadd.xlane.f32.xlu0 %v2806_v6 }
 0xca9   :  { %4241 = vpow2.f32 %v2784_v52  ;;  %v2762_v44 = vsub.f32 %v5111_v0, %v2736_v1  ;;  %v2763_v53 = vsub.f32 %v5117_v34, %v2739_v23 }
 0xcaa   :  { %v5171_v28 = vpop.eup %4231  ;;  %4243 = vpow2.f32 %v2786_v16 }
 0xcab   :  { %v2788_v40 = vmul.f32 1.442695, %v2762_v44  ;;  %v2790_v5 = vmul.f32 1.442695, %v2763_v53  ;;  %v2809_v15 = vsel %vm614_vm3, %v5171_v28, 0.0  ;;  %v5175_v33 = vpop.eup %4233 }
 0xcac   :  { %v2742_v14 = vpop.xlane.xlu0 %2741  ;;  %2810 = vadd.xlane.f32.xlu1 %v2809_v15  ;;  %v2745_v39 = vpop.xlane.xlu1 %2744  ;;  %v2815_v8 = vsel %vm614_vm3, %v5175_v33, 0.0 }
 0xcad   :  { %4245 = vpow2.f32 %v2788_v40  ;;  %v2764_v13 = vsub.f32 %v5093_v63, %v2742_v14  ;;  %v2765_v0 = vsub.f32 %v5099_v38, %v2745_v39 }
 0xcae   :  { %v5179_v27 = vpop.eup %4235  ;;  %4247 = vpow2.f32 %v2790_v5 }
 0xcaf   :  { %v2792_v34 = vmul.f32 1.442695, %v2764_v13  ;;  %v2794_v36 = vmul.f32 1.442695, %v2765_v0  ;;  %v2812_v49 = vsel %vm614_vm3, %v5179_v27, 0.0 }
 0xcb0   :  { %2813 = vadd.xlane.f32.xlu0 %v2812_v49  ;;  %v2748_v57 = vpop.xlane.xlu0 %2747  ;;  %2816 = vadd.xlane.f32.xlu1 %v2815_v8  ;;  %v2936_v20 = vpop.permute.xlu1 %2935 }
 0xcb1   :  { %4249 = vpow2.f32 %v2792_v34  ;;  %v2766_v63 = vsub.f32 %v5123_v50, %v2748_v57  ;;  %3992 = vmatpush3.bf16.msra.mxu0 %v2936_v20 }
 0xcb2   :  { %v5186_v38 = vpop.eup %4237  ;;  %4251 = vpow2.f32 %v2794_v36  ;;  %4003 = vmatprep.subr.bf16.mxu0 %v4289_v29 }
 0xcb3   :  { %v5189_v55 = vpop.eup %4239  ;;  %v2796_v26 = vmul.f32 1.442695, %v2766_v63  ;;  %v2818_v25 = vsel %vm614_vm3, %v5186_v38, 0.0 }
 0xcb4   :  { %2819 = vadd.xlane.f32.xlu0 %v2818_v25  ;;  %v2889_v45 = vpop.permute.xlu0 %2888  ;;  %v2821_v31 = vsel %vm614_vm3, %v5189_v55, 0.0  ;;  %v2983_v15 = vpop.permute.xlu1 %2982 }
 0xcb5   :  { %4253 = vpow2.f32 %v2796_v26  ;;  %2822 = vadd.xlane.f32.xlu1 %v2821_v31  ;;  %3986 = vmatpush3.bf16.msra.mxu1 %v2889_v45 }
 0xcb6   :  { %v5195_v50 = vpop.eup %4241  ;;  %3997 = vmatprep.subr.bf16.mxu1 %v4289_v29 }
 0xcb7   :  { %v5198_v19 = vpop.eup %4243  ;;  %v2824_v62 = vsel %vm614_vm3, %v5195_v50, 0.0 }
 0xcb8   :  { %2825 = vadd.xlane.f32.xlu0 %v2824_v62  ;;  %v2827_v18 = vsel %vm614_vm3, %v5198_v19, 0.0  ;;  %v3030_v14 = vpop.permute.xlu1 %3029 }
 0xcb9   :  { %2828 = vadd.xlane.f32.xlu1 %v2827_v18 }
 0xcba   :  { %v5204_v10 = vpop.eup %4245 }
 0xcbb   :  { %v5206_v52 = vpop.eup %4247  ;;  %v2830_v16 = vsel %vm614_vm3, %v5204_v10, 0.0 }
 0xcbc   :  { %2831 = vadd.xlane.f32.xlu0 %v2830_v16  ;;  %v2833_v6 = vsel %vm614_vm3, %v5206_v52, 0.0 }
 0xcbd   :  { %2834 = vadd.xlane.f32.xlu1 %v2833_v6 }
 0xcbe   :  { %v5212_v1 = vpop.eup %4249 }
 0xcbf   :  { %v5214_v23 = vpop.eup %4251  ;;  %v2836_v44 = vsel %vm614_vm3, %v5212_v1, 0.0 }
 0xcc0   :  { %2837 = vadd.xlane.f32.xlu0 %v2836_v44  ;;  %v2839_v53 = vsel %vm614_vm3, %v5214_v23, 0.0 }
 0xcc1   :  { %2840 = vadd.xlane.f32.xlu1 %v2839_v53 }
 0xcc2   :  { %v5220_v40 = vpop.eup %4253 }
 0xcc3   :  { %v2842_v5 = vsel %vm614_vm3, %v5220_v40, 0.0 }
 0xcc4   :  { %2843 = vadd.xlane.f32.xlu0 %v2842_v5 }
 0xcda   :  { %3170 = vrot.lane.b32.xlu0 %v4705_v7, %s4296_s15 }
 0xcde   :  { %4061 = vrot.lane.b32.xlu0 %v4060_v4, %s4297_s16  ;;  %v3077_v4 = vpop.permute.xlu0 %3076 }
 0xce2   :  { %4066 = vrot.lane.b32.xlu0 %v4065_v32, %s4298_s17 }
 0xce6   :  { %4076 = vrot.lane.b32.xlu0 %v4075_v11, %s4299_s18 }
 0xce9   :  { %v2751_v7 = vpop.xlane.xlu1 %2750 }
 0xcea   :  { %v2767_v39 = vsub.f32 %v5129_v30, %v2751_v7 }
 0xcec   :  { %v2798_v13 = vmul.f32 1.442695, %v2767_v39 }
 0xced   :  { %v5253_v17 = vpop.permute.xlu1 %3123 }
 0xcee   :  { %4255 = vpow2.f32 %v2798_v13 }
 0xcf5   :  { %v2802_v61 = vpop.xlane.xlu0 %2801 }
 0xcf6   :  { %4257 = vrcp.f32 %v2802_v61 }
 0xcfb   :  { %v5239_v9 = vpop.eup %4255 }
 0xcfc   :  { %v2845_v37 = vsel %vm614_vm3, %v5239_v9, 0.0 }
 0xcfd   :  { %2846 = vadd.xlane.f32.xlu1 %v2845_v37 }
 0xd03   :  { %v4258_v32 = vpop.eup %4257 }
 0xd0e   :  { %3217 = vrot.lane.b32.xlu1 %v4720_v21, %s4296_s15  ;;  %v2864_v21 = vmul.f32 %v4258_v32, %v5146_v48 }
 0xd12   :  { %4071 = vrot.lane.b32.xlu1 %v4070_v51, %s4297_s16 }
 0xd16   :  { %4081 = vrot.lane.b32.xlu1 %v4080_v2, %s4298_s17 }
 0xd1e   :  { %v2805_v59 = vpop.xlane.xlu1 %2804 }
 0xd1f   :  { %4259 = vrcp.f32 %v2805_v59 }
 0xd2c   :  { %v4260_v12 = vpop.eup %4259 }
 0xd2d   :  { %v2865_v11 = vmul.f32 %v4260_v12, %v5153_v24 }
 0xd2f   :  { %v2880_v42 = vpack.c.bf16 %v2865_v11, %v2864_v21 }
 0xd31   :  { %v2808_v46 = vpop.xlane.xlu0 %2807  ;;  %3988 = vmatmul.mubr.msk.bf16.vlgmr.msra.gmra.mxu1 %vm614_vm3, %v2880_v42 }
 0xd32   :  { %3998 = vmatpush3.bf16.msra.mxu1 %v2983_v15  ;;  %3999 = vmatprep.mubr.msk.bf16.mxu1 %vm4290_vm2, %v4289_v29  ;;  %4261 = vrcp.f32 %v2808_v46 }
 0xd33   :  { %4009 = vmatprep.subr.bf16.mxu1 %v4289_v29 }
 0xd35   :  { %v2811_v22 = vpop.xlane.xlu1 %2810 }
 0xd36   :  { %4263 = vrcp.f32 %v2811_v22 }
 0xd39   :  { %v2814_v51 = vpop.xlane.xlu0 %2813  ;;  %v2817_v54 = vpop.xlane.xlu1 %2816 }
 0xd3a   :  { %4265 = vrcp.f32 %v2814_v51 }
 0xd3b   :  { %4267 = vrcp.f32 %v2817_v54 }
 0xd3d   :  { %v2820_v2 = vpop.xlane.xlu0 %2819 }
 0xd3e   :  { %4269 = vrcp.f32 %v2820_v2  ;;  %v2823_v30 = vpop.xlane.xlu1 %2822 }
 0xd3f   :  { %4271 = vrcp.f32 %v2823_v30  ;;  %v4262_v48 = vpop.eup %4261 }
 0xd40   :  { %v2866_v36 = vmul.f32 %v4262_v48, %v5165_v56 }
 0xd41   :  { %v2826_v24 = vpop.xlane.xlu0 %2825 }
 0xd42   :  { %4273 = vrcp.f32 %v2826_v24  ;;  %v2829_v0 = vpop.xlane.xlu1 %2828 }
 0xd43   :  { %v4264_v34 = vpop.eup %4263  ;;  %4275 = vrcp.f32 %v2829_v0 }
 0xd44   :  { %v2867_v49 = vmul.f32 %v4264_v34, %v5171_v28 }
 0xd45   :  { %v2832_v8 = vpop.xlane.xlu0 %2831 }
 0xd46   :  { %4277 = vrcp.f32 %v2832_v8  ;;  %v2835_v57 = vpop.xlane.xlu1 %2834  ;;  %v2881_v20 = vpack.c.bf16 %v2867_v49, %v2866_v36 }
 0xd47   :  { %v4266_v63 = vpop.eup %4265  ;;  %4279 = vrcp.f32 %v2835_v57 }
 0xd48   :  { %v4268_v26 = vpop.eup %4267  ;;  %3994 = vmatmul.mubr.msk.bf16.vlgmr.msra.gmra.mxu0 %vm614_vm3, %v2881_v20  ;;  %v2868_v25 = vmul.f32 %v4266_v63, %v5179_v27 }
 0xd49   :  { %4004 = vmatpush3.bf16.msra.mxu0 %v3030_v14  ;;  %v2838_v45 = vpop.xlane.xlu0 %2837  ;;  %v2869_v31 = vmul.f32 %v4268_v26, %v5175_v33  ;;  %4005 = vmatprep.mubr.msk.bf16.mxu0 %vm4290_vm2, %v4289_v29  ;;  %v4141_v26 = vld [vmem:[%s5400_s1 + $0x68] sm:$0xff]  }
 0xd4a   :  { %4281 = vrcp.f32 %v2838_v45  ;;  %v2841_v56 = vpop.xlane.xlu1 %2840  ;;  %4015 = vmatprep.subr.bf16.mxu0 %v4289_v29 }
 0xd4b   :  { %v4270_v28 = vpop.eup %4269  ;;  %4283 = vrcp.f32 %v2841_v56  ;;  %v2882_v62 = vpack.c.bf16 %v2869_v31, %v2868_v25  ;;  %v4142_v56 = vld [vmem:[%s5400_s1 + $0x60] sm:$0xff]  }
 0xd4c   :  { %v4272_v18 = vpop.eup %4271  ;;  %v2870_v16 = vmul.f32 %v4270_v28, %v5186_v38 }
 0xd4d   :  { %4000 = vmatmul.mubr.msk.bf16.vlgmr.msra.gmra.mxu1 %vm614_vm3, %v2882_v62  ;;  %v2844_v27 = vpop.xlane.xlu0 %2843  ;;  %v2871_v6 = vmul.f32 %v4272_v18, %v5189_v55 }
 0xd4e   :  { %4010 = vmatpush3.bf16.msra.mxu1 %v3077_v4  ;;  %4011 = vmatprep.mubr.msk.bf16.mxu1 %vm4290_vm2, %v4289_v29  ;;  %4285 = vrcp.f32 %v2844_v27 }
 0xd4f   :  { %v4274_v33 = vpop.eup %4273  ;;  %v2883_v44 = vpack.c.bf16 %v2871_v6, %v2870_v16  ;;  %4021 = vmatprep.subr.bf16.mxu1 %v4289_v29 }
 0xd50   :  { %v4276_v53 = vpop.eup %4275  ;;  %v2872_v5 = vmul.f32 %v4274_v33, %v5195_v50 }
 0xd51   :  { %4006 = vmatmul.mubr.msk.bf16.vlgmr.msra.gmra.mxu0 %vm614_vm3, %v2883_v44  ;;  %v3171_v15 = vpop.permute.xlu0 %3170  ;;  %v2873_v38 = vmul.f32 %v4276_v53, %v5198_v19 }
 0xd52   :  { %4016 = vmatpush3.bf16.msra.mxu0 %v5253_v17  ;;  %4017 = vmatprep.mubr.msk.bf16.mxu0 %vm4290_vm2, %v4289_v29 }
 0xd53   :  { %v4278_v55 = vpop.eup %4277  ;;  %v2884_v14 = vpack.c.bf16 %v2873_v38, %v2872_v5  ;;  %4027 = vmatprep.subr.bf16.mxu0 %v4289_v29 }
 0xd54   :  { %v4280_v7 = vpop.eup %4279  ;;  %v2874_v39 = vmul.f32 %v4278_v55, %v5204_v10  ;;  %v4143_v55 = vld [vmem:[%s5400_s1 + $0x78] sm:$0xff]  }
 0xd55   :  { %4012 = vmatmul.mubr.msk.bf16.vlgmr.msra.gmra.mxu1 %vm614_vm3, %v2884_v14  ;;  %v4062_v50 = vpop.permute.xlu0 %4061  ;;  %v2875_v13 = vmul.f32 %v4280_v7, %v5206_v52 }
 0xd56   :  { %4022 = vmatpush3.bf16.msra.mxu1 %v3171_v15  ;;  %4023 = vmatprep.mubr.msk.bf16.mxu1 %vm4290_vm2, %v4289_v29  ;;  %v4064_v10 = vunpack.i.h.bf16 %v4062_v50  ;;  %v4063_v32 = vunpack.i.l.bf16 %v4062_v50 }
 0xd57   :  { %v4282_v19 = vpop.eup %4281  ;;  %v2885_v37 = vpack.c.bf16 %v2875_v13, %v2874_v39  ;;  %4033 = vmatprep.subr.bf16.mxu1 %v4141_v26 }
 0xd58   :  { %v4284_v4 = vpop.eup %4283  ;;  %v2876_v17 = vmul.f32 %v4282_v19, %v5212_v1  ;;  %v2262_v1 = vsel %vm343_vm1, %v5029_v60, %v4064_v10  ;;  %v2261_v42 = vsel %vm343_vm1, %v5027_v47, %v4063_v32 }
 0xd59   :  { %4018 = vmatmul.mubr.msk.bf16.vlgmr.msra.gmra.mxu0 %vm614_vm3, %v2885_v37  ;;  %v4067_v61 = vpop.permute.xlu0 %4066  ;;  %v2877_v59 = vmul.f32 %v4284_v4, %v5214_v23 }
 0xd5a   :  { %4029 = vmatprep.mubr.msk.bf16.mxu0 %vm4290_vm2, %v4289_v29  ;;  %v4069_v52 = vunpack.i.h.bf16 %v4067_v61  ;;  %v4068_v12 = vunpack.i.l.bf16 %v4067_v61 }
 0xd5b   :  { %v2886_v21 = vpack.c.bf16 %v2877_v59, %v2876_v17  ;;  %v4286_v48 = vpop.eup %4285  ;;  %v4144_v59 = vld [vmem:[%s5400_s1 + $0x70] sm:$0xff]  }
 0xd5c   :  { %v2263_v22 = vsel %vm614_vm3, %v2261_v42, %v4068_v12  ;;  %v2264_v51 = vsel %vm614_vm3, %v2262_v1, %v4069_v52  ;;  %v2878_v24 = vmul.f32 %v4286_v48, %v5220_v40 }
 0xd5d   :  { %4024 = vmatmul.mubr.msk.bf16.vlgmr.msra.gmra.mxu1 %vm614_vm3, %v2886_v21  ;;  %v4077_v11 = vpop.permute.xlu0 %4076 }
 0xd5e   :  { %v4079_v46 = vunpack.i.h.bf16 %v4077_v11  ;;  %v4078_v23 = vunpack.i.l.bf16 %v4077_v11  ;;  %4034 = vmatpush3.bf16.msra.mxu1 %v4141_v26 }
 0xd5f   :  { %4035 = vmatprep.subr.bf16.mxu1 %v4142_v56 }
 0xd60   :  { %v2266_v29 = vsel %vm2265_vm4, %v2263_v22, %v4078_v23  ;;  %v2267_v54 = vsel %vm2265_vm4, %v2264_v51, %v4079_v46 }
 0xd61   :  { %v3324_v2 = vpack.c.bf16 %v2267_v54, %v2266_v29 }
 0xd62   :  { %4036 = vmatpush3.bf16.msra.mxu1 %v4142_v56 }
 0xd63   :  { %4037 = vmatprep.mubr.msk.bf16.mxu1 %vm59_vm0, %v3324_v2 }
 0xd86   :  { %v2847_v30 = vpop.xlane.xlu1 %2846 }
 0xd87   :  { %4287 = vrcp.f32 %v2847_v30 }
 0xd8a   :  { %v3218_v60 = vpop.permute.xlu1 %3217 }
 0xd8b   :  { %4028 = vmatpush3.bf16.msra.mxu0 %v3218_v60 }
 0xd8c   :  { %4041 = vmatprep.subr.bf16.mxu0 %v4143_v55 }
 0xd8e   :  { %v4072_v52 = vpop.permute.xlu1 %4071 }
 0xd8f   :  { %v4074_v22 = vunpack.i.h.bf16 %v4072_v52  ;;  %v4073_v51 = vunpack.i.l.bf16 %v4072_v52 }
 0xd92   :  { %v4082_v12 = vpop.permute.xlu1 %4081 }
 0xd93   :  { %v4084_v48 = vunpack.i.h.bf16 %v4082_v12 }
 0xd94   :  { %v4288_v47 = vpop.eup %4287 }
 0xd95   :  { %v2879_v0 = vmul.f32 %v4288_v47, %v5239_v9  ;;  %v4083_v47 = vunpack.i.l.bf16 %v4082_v12 }
 0xd97   :  { %v2887_v34 = vpack.c.bf16 %v2879_v0, %v2878_v24 }
 0xd99   :  { %4030 = vmatmul.mubr.msk.bf16.vlgmr.msra.gmra.mxu0 %vm614_vm3, %v2887_v34 }
 0xd9a   :  { %4042 = vmatpush3.bf16.msra.mxu0 %v4143_v55 }
 0xd9b   :  { %4043 = vmatprep.subr.bf16.mxu0 %v4144_v59 }
 0xd9e   :  { %4044 = vmatpush3.bf16.msra.mxu0 %v4144_v59 }
 0xdf1   :  { %v5305_v36 = vpop.f32.mrf.mxu1 }
 0xdf3   :  { %v3989_v49 = vpop.f32.mrf.mxu1 }
 0xdf5   :  { %v5307_v8 = vpop.f32.mrf.mxu1 }
 0xdf7   :  { %v3990_v57 = vpop.f32.mrf.mxu1 }
 0xe08   :  { %v2975_v20 = vpop.f32.mrf.mxu0 }
 0xe0a   :  { %v3995_v63 = vpop.f32.mrf.mxu0 }
 0xe0c   :  { %v2978_v25 = vpop.f32.mrf.mxu0 }
 0xe0d   :  { %v4085_v45 = vpack.i.bf16 %v2978_v25, %v2975_v20  ;;  %v3022_v40 = vpop.f32.mrf.mxu1 }
 0xe0e   :  { %v3996_v9 = vpop.f32.mrf.mxu0 }
 0xe0f   :  { %v4001_v31 = vpop.f32.mrf.mxu1  ;;  %4086 = vrot.lane.b32.xlu1 %v4085_v45, %s4297_s16 }
 0xe11   :  { %v3025_v28 = vpop.f32.mrf.mxu1  ;;  %v3069_v62 = vpop.f32.mrf.mxu0 }
 0xe12   :  { %v4090_v18 = vpack.i.bf16 %v3025_v28, %v3022_v40 }
 0xe13   :  { %v4002_v16 = vpop.f32.mrf.mxu1  ;;  %v4007_v27 = vpop.f32.mrf.mxu0 }
 0xe14   :  { %4091 = vrot.lane.b32.xlu0 %v4090_v18, %s4298_s17 }
 0xe15   :  { %v3072_v6 = vpop.f32.mrf.mxu0  ;;  %v5317_v33 = vpop.f32.mrf.mxu1 }
 0xe16   :  { %v4095_v44 = vpack.i.bf16 %v3072_v6, %v3069_v62 }
 0xe17   :  { %v4008_v53 = vpop.f32.mrf.mxu0  ;;  %v4013_v5 = vpop.f32.mrf.mxu1 }
 0xe18   :  { %4096 = vrot.lane.b32.xlu0 %v4095_v44, %s4299_s18 }
 0xe19   :  { %v5320_v15 = vpop.f32.mrf.mxu1  ;;  %v3163_v38 = vpop.f32.mrf.mxu0 }
 0xe1b   :  { %v4014_v14 = vpop.f32.mrf.mxu1  ;;  %v4019_v7 = vpop.f32.mrf.mxu0 }
 0xe1c   :  { %4111 = vrot.lane.b32.xlu0 %v4110_v3, %s4299_s18 }
 0xe1d   :  { %v3166_v39 = vpop.f32.mrf.mxu0  ;;  %v3210_v50 = vpop.f32.mrf.mxu1 }
 0xe1e   :  { %v4100_v13 = vpack.i.bf16 %v3166_v39, %v3163_v38 }
 0xe1f   :  { %v4020_v19 = vpop.f32.mrf.mxu0  ;;  %v4025_v37 = vpop.f32.mrf.mxu1 }
 0xe20   :  { %4101 = vrot.lane.b32.xlu1 %v4100_v13, %s4297_s16 }
 0xe21   :  { %v3213_v4 = vpop.f32.mrf.mxu1 }
 0xe22   :  { %v4105_v17 = vpack.i.bf16 %v3213_v4, %v3210_v50 }
 0xe23   :  { %v4026_v61 = vpop.f32.mrf.mxu1 }
 0xe24   :  { %4106 = vrot.lane.b32.xlu1 %v4105_v17, %s4298_s17  ;;  %v3588_v61 = vld [vmem:[%s5402_s6 + $0x24] ss:$0 sm:$0xff] }
 0xe59   :  { %v3257_v35 = vpop.f32.mrf.mxu0 }
 0xe5b   :  { %v4031_v41 = vpop.f32.mrf.mxu0 }
 0xe5d   :  { %v3260_v3 = vpop.f32.mrf.mxu0 }
 0xe5e   :  { %v4115_v10 = vpack.i.bf16 %v3260_v3, %v3257_v35 }
 0xe5f   :  { %v4032_v32 = vpop.f32.mrf.mxu0 }
 0xe60   :  { %4116 = vrot.lane.b32.xlu1 %v4115_v10, %s4299_s18 }
 0xe81   :  { %v4087_v21 = vpop.permute.xlu1 %4086 }
 0xe82   :  { %v4089_v1 = vunpack.i.h.bf16 %v4087_v21  ;;  %v4088_v42 = vunpack.i.l.bf16 %v4087_v21 }
 0xe84   :  { %v3288_v54 = vsel %vm343_vm1, %v5305_v36, %v4088_v42  ;;  %v3289_v2 = vsel %vm343_vm1, %v5307_v8, %v4089_v1  ;;  %v2293_v36 = vsel %vm343_vm1, %v5051_v43, %v4074_v22  ;;  %v2292_v8 = vsel %vm343_vm1, %v5047_v58, %v4073_v51 }
 0xe85   :  { %v2294_v25 = vsel %vm614_vm3, %v2292_v8, %v4083_v47  ;;  %v2295_v45 = vsel %vm614_vm3, %v2293_v36, %v4084_v48 }
 0xe86   :  { %v4092_v11 = vpop.permute.xlu0 %4091 }
 0xe87   :  { %v4094_v46 = vunpack.i.h.bf16 %v4092_v11  ;;  %v4093_v23 = vunpack.i.l.bf16 %v4092_v11 }
 0xe89   :  { %v3291_v24 = vsel %vm614_vm3, %v3289_v2, %v4094_v46  ;;  %v3290_v0 = vsel %vm614_vm3, %v3288_v54, %v4093_v23 }
 0xe8a   :  { %v4097_v29 = vpop.permute.xlu0 %4096 }
 0xe8b   :  { %v4099_v30 = vunpack.i.h.bf16 %v4097_v29  ;;  %v4098_v60 = vunpack.i.l.bf16 %v4097_v29 }
 0xe8d   :  { %v3292_v34 = vsel %vm2265_vm4, %v3290_v0, %v4098_v60  ;;  %v3293_v49 = vsel %vm2265_vm4, %v3291_v24, %v4099_v30 }
 0xe8e   :  { %v3402_v57 = vpack.c.bf16 %v3293_v49, %v3292_v34  ;;  %v4112_v20 = vpop.permute.xlu0 %4111 }
 0xe8f   :  { %v4114_v63 = vunpack.i.h.bf16 %v4112_v20  ;;  %v4113_v26 = vunpack.i.l.bf16 %v4112_v20 }
 0xe90   :  { %4045 = vmatprep.mubr.msk.bf16.mxu0 %vm59_vm0, %v3402_v57 }
 0xe91   :  { %v2297_v40 = vsel %vm2265_vm4, %v2295_v45, %v4114_v63  ;;  %v2296_v9 = vsel %vm2265_vm4, %v2294_v25, %v4113_v26 }
 0xe92   :  { %v3325_v31 = vpack.c.bf16 %v2297_v40, %v2296_v9  ;;  %v4102_v56 = vpop.permute.xlu1 %4101 }
 0xe93   :  { %v4104_v28 = vunpack.i.h.bf16 %v4102_v56  ;;  %v4103_v62 = vunpack.i.l.bf16 %v4102_v56 }
 0xe94   :  { %4038 = vmatmul.mubr.msk.bf16.vlgmr.msra.gmra.mxu1 %vm59_vm0, %v3325_v31 }
 0xe95   :  { %v3318_v27 = vsel %vm343_vm1, %v5317_v33, %v4103_v62  ;;  %v3319_v6 = vsel %vm343_vm1, %v5320_v15, %v4104_v28  ;;  %v3583_v33 = vld [vmem:[%s5402_s6 + $0x23] ss:$0 sm:$0xff] }
 0xe96   :  { %v4107_v43 = vpop.permute.xlu1 %4106 }
 0xe97   :  { %v4109_v58 = vunpack.i.h.bf16 %v4107_v43  ;;  %v4108_v18 = vunpack.i.l.bf16 %v4107_v43 }
 0xe99   :  { %v3321_v5 = vsel %vm614_vm3, %v3319_v6, %v4109_v58  ;;  %v3320_v38 = vsel %vm614_vm3, %v3318_v27, %v4108_v18 }
 0xed2   :  { %v4117_v16 = vpop.permute.xlu1 %4116 }
 0xed3   :  { %v4119_v44 = vunpack.i.h.bf16 %v4117_v16  ;;  %v4118_v53 = vunpack.i.l.bf16 %v4117_v16 }
 0xed5   :  { %v3322_v55 = vsel %vm2265_vm4, %v3320_v38, %v4118_v53  ;;  %v3323_v14 = vsel %vm2265_vm4, %v3321_v5, %v4119_v44 }
 0xed6   :  { %v3403_v7 = vpack.c.bf16 %v3323_v14, %v3322_v55 }
 0xed8   :  { %4046 = vmatmul.mubr.msk.bf16.vlgmr.msra.gmra.mxu0 %vm59_vm0, %v3403_v7 }
 0xf54   :  { %v4039_v39 = vpop.f32.mrf.mxu1 }
 0xf55   :  { %v3396_v50 = vadd.f32 %v4039_v39, %v3583_v33 }
 0xf56   :  { %v3387_v15 = vpop.f32.mrf.mxu1 }
 0xf57   :  { %3595 = vst.msk [vmem:[%s5407_s7 + $0x30] sm:$0xff] %vm59_vm0, %v3396_v50  ;;  %v3388_v13 = vadd.f32 %v3583_v33, %v3387_v15 }
 0xf58   :  { %v4040_v19 = vpop.f32.mrf.mxu1 }
 0xf59   :  { %3593 = vst.msk [vmem:[%s5407_s7 + $0x20] sm:$0xff] %vm59_vm0, %v3388_v13  ;;  %v3399_v37 = vadd.f32 %v4040_v19, %v3583_v33 }
 0xf5a   :  { %v3390_v4 = vpop.f32.mrf.mxu1 }
 0xf5b   :  { %3596 = vst.msk [vmem:[%s5407_s7 + $0x38] sm:$0xff] %vm59_vm0, %v3399_v37  ;;  %v3391_v17 = vadd.f32 %v3583_v33, %v3390_v4 }
 0xf5d   :  { %3594 = vst.msk [vmem:[%s5407_s7 + $0x28] sm:$0xff] %vm59_vm0, %v3391_v17 }
 0xf98   :  { %v4047_v59 = vpop.f32.mrf.mxu0 }
 0xf99   :  { %v3474_v35 = vadd.f32 %v4047_v59, %v3588_v61 }
 0xf9a   :  { %v3465_v41 = vpop.f32.mrf.mxu0 }
 0xf9b   :  { %3482 = vst.msk [vmem:[%s5407_s7 + $0x10] sm:$0xff] %vm59_vm0, %v3474_v35  ;;  %v3466_v3 = vadd.f32 %v3588_v61, %v3465_v41 }
 0xf9c   :  { %v4048_v10 = vpop.f32.mrf.mxu0 }
 0xf9d   :  { %3480 = vst.msk [vmem:[%s5407_s7] sm:$0xff] %vm59_vm0, %v3466_v3  ;;  %v3477_v32 = vadd.f32 %v4048_v10, %v3588_v61 }
 0xf9e   :  { %v3468_v52 = vpop.f32.mrf.mxu0 }
 0xf9f   :  { %3483 = vst.msk [vmem:[%s5407_s7 + $0x18] sm:$0xff] %vm59_vm0, %v3477_v32  ;;  %v3469_v12 = vadd.f32 %v3588_v61, %v3468_v52 }
 0xfa1   :  { %3481 = vst.msk [vmem:[%s5407_s7 + $0x8] sm:$0xff] %vm59_vm0, %v3469_v12 }

</bundles_post_ra>
